<compile_context>
chip_gen: v5e
topology: v5e:2x2
jax: 0.10.0
libtpu: 0.0.40
codegen_flags: <defaults>
</compile_context>

<pallas_src>
import functools

import jax
import jax.numpy as jnp
import numpy as np
from jax.experimental import pallas as pl
from jax.experimental.pallas import tpu as pltpu

MID = 4  # mid_channels in the PyTorch module


def csam_kernel(x_ref, rc_ref, w1_ref, b1_ref, w2_ref, o_ref, *, H, W):
    # x_ref / o_ref : (1, C, H*W) block (one image, channel-first, flat spatial)
    # rc_ref        : (2, H*W) int32 VMEM, rc[0]=row index, rc[1]=col index
    # w1_ref        : (MID, C) f32 SMEM   (conv1 weight)
    # b1_ref        : (MID,)   f32 SMEM   (conv1 bias)
    # w2_ref        : (9, MID) f32 SMEM   (conv2 weight, k = ky*3+kx)
    _, C, HW = x_ref.shape
    x = x_ref[0]                               # (C, HW) original input
    y = jnp.maximum(x, 0.0)                    # ReLU

    # ---- 1x1 conv (C -> MID): VPU scalar-broadcast FMAs -------------------
    mid = []
    for m in range(MID):
        acc = y[0:1, :] * w1_ref[m, 0] + b1_ref[m]
        for c in range(1, C):
            acc = acc + y[c:c + 1, :] * w1_ref[m, c]
        mid.append(acc)                        # each (1, HW)

    # ---- 3x3 conv (MID -> 1), padding=1: roll + boundary masks ------------
    row = rc_ref[0:1, :]                       # (1, HW) int32
    col = rc_ref[1:2, :]                       # (1, HW) int32
    not_top = row >= 1                         # source row-1 exists (dy=-1)
    not_bottom = row < (H - 1)                 # source row+1 exists (dy=+1)
    not_left = col >= 1                        # source col-1 exists (dx=-1)
    not_right = col < (W - 1)                  # source col+1 exists (dx=+1)

    conv = None
    for ky in range(3):
        dy = ky - 1
        for kx in range(3):
            dx = kx - 1
            k = ky * 3 + kx
            # Combine the MID planes with this tap's weights first; shifting
            # / masking afterwards is equivalent (linear) and cheaper.
            t = mid[0] * w2_ref[k, 0]
            for m in range(1, MID):
                t = t + mid[m] * w2_ref[k, m]
            d = dy * W + dx                    # source offset in flat index
            if d != 0:
                t = pltpu.roll(t, (-d) % HW, axis=1)   # XLU lane rotate
            mask = None
            if dy == 1:
                mask = not_bottom
            elif dy == -1:
                mask = not_top
            if dx == 1:
                mask = not_right if mask is None else jnp.logical_and(mask, not_right)
            elif dx == -1:
                mask = not_left if mask is None else jnp.logical_and(mask, not_left)
            if mask is not None:
                t = jnp.where(mask, t, 0.0)
            conv = t if conv is None else conv + t

    att = jax.nn.sigmoid(conv)                 # (1, HW)
    # Channel-first: att broadcasts along sublanes -> plain VPU multiply.
    o_ref[0] = (x * att).astype(o_ref.dtype)


def csam_forward(x_nchw, w1, b1, w2):
    """x_nchw: (N, C, H, W) f32. w1: (MID, C). b1: (MID,). w2: (9, MID)."""
    N, C, H, W = x_nchw.shape
    HW = H * W
    x = x_nchw.reshape(N, C, HW)               # free view (contiguous dims)

    # Precomputed row/col maps for the conv boundary masks (avoids integer
    # div/mod on the VPU inside the kernel).
    rows = jax.lax.broadcasted_iota(jnp.int32, (H, W), 0).reshape(1, HW)
    cols = jax.lax.broadcasted_iota(jnp.int32, (H, W), 1).reshape(1, HW)
    rc = jnp.concatenate([rows, cols], axis=0)  # (2, HW)

    # TODO(synk): for large H*W, add a row-tile grid axis with a 1-row halo
    # (overlapping element-offset blocks) to bound VMEM (v7x: 64 MiB/TC) and
    # expose deeper pipelining; per-image blocks are ample at these sizes.

    flops = N * HW * (2 * C * MID + 2 * 9 * MID + C + 9)
    bytes_accessed = 2 * N * C * HW * 4 + 2 * HW * 4 + (MID * C + MID + 9 * MID) * 4

    out = pl.pallas_call(
        functools.partial(csam_kernel, H=H, W=W),
        out_shape=jax.ShapeDtypeStruct((N, C, HW), x.dtype),
        grid=(N,),
        in_specs=[
            pl.BlockSpec((1, C, HW), lambda n: (n, 0, 0)),            # x
            pl.BlockSpec((2, HW), lambda n: (0, 0)),                  # rc map
            pl.BlockSpec(memory_space=pltpu.MemorySpace.SMEM),        # w1
            pl.BlockSpec(memory_space=pltpu.MemorySpace.SMEM),        # b1
            pl.BlockSpec(memory_space=pltpu.MemorySpace.SMEM),        # w2
        ],
        out_specs=pl.BlockSpec((1, C, HW), lambda n: (n, 0, 0)),
        compiler_params=pltpu.CompilerParams(
            dimension_semantics=("parallel",)),
        cost_estimate=pl.CostEstimate(
            flops=flops, transcendentals=N * HW,
            bytes_accessed=bytes_accessed),
    )(x, rc, w1, b1, w2)
    return out.reshape(N, C, H, W)


def csam_ref(x_nchw, w1, b1, w2):
    """Pure-JAX reference (matches PyTorch semantics)."""
    x = jnp.transpose(x_nchw, (0, 2, 3, 1))    # NHWC
    y = jax.nn.relu(x)
    y = jnp.einsum('nhwc,mc->nhwm', y, w1) + b1
    w2_hwio = w2.reshape(3, 3, MID, 1)         # (ky, kx, in=MID, out=1)
    y = jax.lax.conv_general_dilated(
        y, w2_hwio, window_strides=(1, 1), padding='SAME',
        dimension_numbers=('NHWC', 'HWIO', 'NHWC'))
    att = jax.nn.sigmoid(y)
    return jnp.transpose(x * att, (0, 3, 1, 2))


if __name__ == "__main__":
    key = jax.random.PRNGKey(0)
    k_x, k_w1, k_b1, k_w2 = jax.random.split(key, 4)

    N, C, H, W = 2, 8, 16, 16
    x = jax.random.normal(k_x, (N, C, H, W), dtype=jnp.float32)

    # PyTorch params: conv1.weight (MID,C,1,1) + bias (MID,), conv2.weight
    # (1,MID,3,3) no bias. Stored here as w1 (MID,C), b1 (MID,), w2 (9,MID)
    # with w2[ky*3+kx, m] == conv2.weight[0, m, ky, kx].
    w1 = 0.1 * jax.random.normal(k_w1, (MID, C), dtype=jnp.float32)
    b1 = 0.1 * jax.random.normal(k_b1, (MID,), dtype=jnp.float32)
    w2 = 0.1 * jax.random.normal(k_w2, (9, MID), dtype=jnp.float32)

    out = csam_forward(x, w1, b1, w2)
    out = jax.block_until_ready(out)

    ref = csam_ref(x, w1, b1, w2)
    np.testing.assert_allclose(np.asarray(out), np.asarray(ref),
                               atol=1e-5, rtol=1e-5)
    print("KERNEL_OK")
</pallas_src>

<mosaic_0001>
module attributes {stable_mosaic.version = 11 : i64} {
  func.func @csam_kernel(%arg0: i32, %arg1: memref<1x8x256xf32, #tpu.memory_space<vmem>>, %arg2: memref<2x256xi32, #tpu.memory_space<vmem>>, %arg3: memref<4x8xf32, #tpu.memory_space<smem>>, %arg4: memref<4xf32, #tpu.memory_space<smem>>, %arg5: memref<9x4xf32, #tpu.memory_space<smem>>, %arg6: memref<1x8x256xf32, #tpu.memory_space<vmem>>) attributes {dimension_semantics = [#tpu.dimension_semantics<parallel>], iteration_bounds = array<i64: 2>, scalar_prefetch = 0 : i64, scratch_operands = 0 : i64, tpu.core_type = #tpu.core_type<tc>, window_params = [{transform_indices = @transform_0, window_bounds = array<i64: 1, 8, 256>}, {pipeline_mode = #tpu.pipeline_mode<synchronous>, transform_indices = @transform_1, window_bounds = array<i64: 2, 256>}, {transform_indices = @transform_2, window_bounds = array<i64: 4, 8>}, {transform_indices = @transform_3, window_bounds = array<i64: 4>}, {transform_indices = @transform_4, window_bounds = array<i64: 9, 4>}, {transform_indices = @transform_5, window_bounds = array<i64: 1, 8, 256>}]} {
    %c0 = arith.constant 0 : index
    %c0_0 = arith.constant 0 : index
    %c0_1 = arith.constant 0 : index
    %0 = vector.load %arg1[%c0, %c0_0, %c0_1] : memref<1x8x256xf32, #tpu.memory_space<vmem>>, vector<1x8x256xf32>
    %1 = vector.shape_cast %0 : vector<1x8x256xf32> to vector<8x256xf32>
    %cst = arith.constant 0.000000e+00 : f32
    %2 = vector.broadcast %cst : f32 to vector<8x256xf32>
    %3 = arith.maximumf %1, %2 : vector<8x256xf32>
    %4 = vector.extract_strided_slice %3 {offsets = [0, 0], sizes = [1, 256], strides = [1, 1]} : vector<8x256xf32> to vector<1x256xf32>
    %c0_2 = arith.constant 0 : index
    %c0_3 = arith.constant 0 : index
    %5 = memref.load %arg3[%c0_2, %c0_3] : memref<4x8xf32, #tpu.memory_space<smem>>
    %6 = vector.broadcast %5 : f32 to vector<1x256xf32>
    %7 = arith.mulf %4, %6 : vector<1x256xf32>
    %c0_4 = arith.constant 0 : index
    %8 = memref.load %arg4[%c0_4] : memref<4xf32, #tpu.memory_space<smem>>
    %9 = vector.broadcast %8 : f32 to vector<1x256xf32>
    %10 = arith.addf %7, %9 : vector<1x256xf32>
    %11 = vector.extract_strided_slice %3 {offsets = [1, 0], sizes = [1, 256], strides = [1, 1]} : vector<8x256xf32> to vector<1x256xf32>
    %c0_5 = arith.constant 0 : index
    %c1 = arith.constant 1 : index
    %12 = memref.load %arg3[%c0_5, %c1] : memref<4x8xf32, #tpu.memory_space<smem>>
    %13 = vector.broadcast %12 : f32 to vector<1x256xf32>
    %14 = arith.mulf %11, %13 : vector<1x256xf32>
    %15 = arith.addf %10, %14 : vector<1x256xf32>
    %16 = vector.extract_strided_slice %3 {offsets = [2, 0], sizes = [1, 256], strides = [1, 1]} : vector<8x256xf32> to vector<1x256xf32>
    %c0_6 = arith.constant 0 : index
    %c2 = arith.constant 2 : index
    %17 = memref.load %arg3[%c0_6, %c2] : memref<4x8xf32, #tpu.memory_space<smem>>
    %18 = vector.broadcast %17 : f32 to vector<1x256xf32>
    %19 = arith.mulf %16, %18 : vector<1x256xf32>
    %20 = arith.addf %15, %19 : vector<1x256xf32>
    %21 = vector.extract_strided_slice %3 {offsets = [3, 0], sizes = [1, 256], strides = [1, 1]} : vector<8x256xf32> to vector<1x256xf32>
    %c0_7 = arith.constant 0 : index
    %c3 = arith.constant 3 : index
    %22 = memref.load %arg3[%c0_7, %c3] : memref<4x8xf32, #tpu.memory_space<smem>>
    %23 = vector.broadcast %22 : f32 to vector<1x256xf32>
    %24 = arith.mulf %21, %23 : vector<1x256xf32>
    %25 = arith.addf %20, %24 : vector<1x256xf32>
    %26 = vector.extract_strided_slice %3 {offsets = [4, 0], sizes = [1, 256], strides = [1, 1]} : vector<8x256xf32> to vector<1x256xf32>
    %c0_8 = arith.constant 0 : index
    %c4 = arith.constant 4 : index
    %27 = memref.load %arg3[%c0_8, %c4] : memref<4x8xf32, #tpu.memory_space<smem>>
    %28 = vector.broadcast %27 : f32 to vector<1x256xf32>
    %29 = arith.mulf %26, %28 : vector<1x256xf32>
    %30 = arith.addf %25, %29 : vector<1x256xf32>
    %31 = vector.extract_strided_slice %3 {offsets = [5, 0], sizes = [1, 256], strides = [1, 1]} : vector<8x256xf32> to vector<1x256xf32>
    %c0_9 = arith.constant 0 : index
    %c5 = arith.constant 5 : index
    %32 = memref.load %arg3[%c0_9, %c5] : memref<4x8xf32, #tpu.memory_space<smem>>
    %33 = vector.broadcast %32 : f32 to vector<1x256xf32>
    %34 = arith.mulf %31, %33 : vector<1x256xf32>
    %35 = arith.addf %30, %34 : vector<1x256xf32>
    %36 = vector.extract_strided_slice %3 {offsets = [6, 0], sizes = [1, 256], strides = [1, 1]} : vector<8x256xf32> to vector<1x256xf32>
    %c0_10 = arith.constant 0 : index
    %c6 = arith.constant 6 : index
    %37 = memref.load %arg3[%c0_10, %c6] : memref<4x8xf32, #tpu.memory_space<smem>>
    %38 = vector.broadcast %37 : f32 to vector<1x256xf32>
    %39 = arith.mulf %36, %38 : vector<1x256xf32>
    %40 = arith.addf %35, %39 : vector<1x256xf32>
    %41 = vector.extract_strided_slice %3 {offsets = [7, 0], sizes = [1, 256], strides = [1, 1]} : vector<8x256xf32> to vector<1x256xf32>
    %c0_11 = arith.constant 0 : index
    %c7 = arith.constant 7 : index
    %42 = memref.load %arg3[%c0_11, %c7] : memref<4x8xf32, #tpu.memory_space<smem>>
    %43 = vector.broadcast %42 : f32 to vector<1x256xf32>
    %44 = arith.mulf %41, %43 : vector<1x256xf32>
    %45 = arith.addf %40, %44 : vector<1x256xf32>
    %46 = vector.extract_strided_slice %3 {offsets = [0, 0], sizes = [1, 256], strides = [1, 1]} : vector<8x256xf32> to vector<1x256xf32>
    %c1_12 = arith.constant 1 : index
    %c0_13 = arith.constant 0 : index
    %47 = memref.load %arg3[%c1_12, %c0_13] : memref<4x8xf32, #tpu.memory_space<smem>>
    %48 = vector.broadcast %47 : f32 to vector<1x256xf32>
    %49 = arith.mulf %46, %48 : vector<1x256xf32>
    %c1_14 = arith.constant 1 : index
    %50 = memref.load %arg4[%c1_14] : memref<4xf32, #tpu.memory_space<smem>>
    %51 = vector.broadcast %50 : f32 to vector<1x256xf32>
    %52 = arith.addf %49, %51 : vector<1x256xf32>
    %53 = vector.extract_strided_slice %3 {offsets = [1, 0], sizes = [1, 256], strides = [1, 1]} : vector<8x256xf32> to vector<1x256xf32>
    %c1_15 = arith.constant 1 : index
    %c1_16 = arith.constant 1 : index
    %54 = memref.load %arg3[%c1_15, %c1_16] : memref<4x8xf32, #tpu.memory_space<smem>>
    %55 = vector.broadcast %54 : f32 to vector<1x256xf32>
    %56 = arith.mulf %53, %55 : vector<1x256xf32>
    %57 = arith.addf %52, %56 : vector<1x256xf32>
    %58 = vector.extract_strided_slice %3 {offsets = [2, 0], sizes = [1, 256], strides = [1, 1]} : vector<8x256xf32> to vector<1x256xf32>
    %c1_17 = arith.constant 1 : index
    %c2_18 = arith.constant 2 : index
    %59 = memref.load %arg3[%c1_17, %c2_18] : memref<4x8xf32, #tpu.memory_space<smem>>
    %60 = vector.broadcast %59 : f32 to vector<1x256xf32>
    %61 = arith.mulf %58, %60 : vector<1x256xf32>
    %62 = arith.addf %57, %61 : vector<1x256xf32>
    %63 = vector.extract_strided_slice %3 {offsets = [3, 0], sizes = [1, 256], strides = [1, 1]} : vector<8x256xf32> to vector<1x256xf32>
    %c1_19 = arith.constant 1 : index
    %c3_20 = arith.constant 3 : index
    %64 = memref.load %arg3[%c1_19, %c3_20] : memref<4x8xf32, #tpu.memory_space<smem>>
    %65 = vector.broadcast %64 : f32 to vector<1x256xf32>
    %66 = arith.mulf %63, %65 : vector<1x256xf32>
    %67 = arith.addf %62, %66 : vector<1x256xf32>
    %68 = vector.extract_strided_slice %3 {offsets = [4, 0], sizes = [1, 256], strides = [1, 1]} : vector<8x256xf32> to vector<1x256xf32>
    %c1_21 = arith.constant 1 : index
    %c4_22 = arith.constant 4 : index
    %69 = memref.load %arg3[%c1_21, %c4_22] : memref<4x8xf32, #tpu.memory_space<smem>>
    %70 = vector.broadcast %69 : f32 to vector<1x256xf32>
    %71 = arith.mulf %68, %70 : vector<1x256xf32>
    %72 = arith.addf %67, %71 : vector<1x256xf32>
    %73 = vector.extract_strided_slice %3 {offsets = [5, 0], sizes = [1, 256], strides = [1, 1]} : vector<8x256xf32> to vector<1x256xf32>
    %c1_23 = arith.constant 1 : index
    %c5_24 = arith.constant 5 : index
    %74 = memref.load %arg3[%c1_23, %c5_24] : memref<4x8xf32, #tpu.memory_space<smem>>
    %75 = vector.broadcast %74 : f32 to vector<1x256xf32>
    %76 = arith.mulf %73, %75 : vector<1x256xf32>
    %77 = arith.addf %72, %76 : vector<1x256xf32>
    %78 = vector.extract_strided_slice %3 {offsets = [6, 0], sizes = [1, 256], strides = [1, 1]} : vector<8x256xf32> to vector<1x256xf32>
    %c1_25 = arith.constant 1 : index
    %c6_26 = arith.constant 6 : index
    %79 = memref.load %arg3[%c1_25, %c6_26] : memref<4x8xf32, #tpu.memory_space<smem>>
    %80 = vector.broadcast %79 : f32 to vector<1x256xf32>
    %81 = arith.mulf %78, %80 : vector<1x256xf32>
    %82 = arith.addf %77, %81 : vector<1x256xf32>
    %83 = vector.extract_strided_slice %3 {offsets = [7, 0], sizes = [1, 256], strides = [1, 1]} : vector<8x256xf32> to vector<1x256xf32>
    %c1_27 = arith.constant 1 : index
    %c7_28 = arith.constant 7 : index
    %84 = memref.load %arg3[%c1_27, %c7_28] : memref<4x8xf32, #tpu.memory_space<smem>>
    %85 = vector.broadcast %84 : f32 to vector<1x256xf32>
    %86 = arith.mulf %83, %85 : vector<1x256xf32>
    %87 = arith.addf %82, %86 : vector<1x256xf32>
    %88 = vector.extract_strided_slice %3 {offsets = [0, 0], sizes = [1, 256], strides = [1, 1]} : vector<8x256xf32> to vector<1x256xf32>
    %c2_29 = arith.constant 2 : index
    %c0_30 = arith.constant 0 : index
    %89 = memref.load %arg3[%c2_29, %c0_30] : memref<4x8xf32, #tpu.memory_space<smem>>
    %90 = vector.broadcast %89 : f32 to vector<1x256xf32>
    %91 = arith.mulf %88, %90 : vector<1x256xf32>
    %c2_31 = arith.constant 2 : index
    %92 = memref.load %arg4[%c2_31] : memref<4xf32, #tpu.memory_space<smem>>
    %93 = vector.broadcast %92 : f32 to vector<1x256xf32>
    %94 = arith.addf %91, %93 : vector<1x256xf32>
    %95 = vector.extract_strided_slice %3 {offsets = [1, 0], sizes = [1, 256], strides = [1, 1]} : vector<8x256xf32> to vector<1x256xf32>
    %c2_32 = arith.constant 2 : index
    %c1_33 = arith.constant 1 : index
    %96 = memref.load %arg3[%c2_32, %c1_33] : memref<4x8xf32, #tpu.memory_space<smem>>
    %97 = vector.broadcast %96 : f32 to vector<1x256xf32>
    %98 = arith.mulf %95, %97 : vector<1x256xf32>
    %99 = arith.addf %94, %98 : vector<1x256xf32>
    %100 = vector.extract_strided_slice %3 {offsets = [2, 0], sizes = [1, 256], strides = [1, 1]} : vector<8x256xf32> to vector<1x256xf32>
    %c2_34 = arith.constant 2 : index
    %c2_35 = arith.constant 2 : index
    %101 = memref.load %arg3[%c2_34, %c2_35] : memref<4x8xf32, #tpu.memory_space<smem>>
    %102 = vector.broadcast %101 : f32 to vector<1x256xf32>
    %103 = arith.mulf %100, %102 : vector<1x256xf32>
    %104 = arith.addf %99, %103 : vector<1x256xf32>
    %105 = vector.extract_strided_slice %3 {offsets = [3, 0], sizes = [1, 256], strides = [1, 1]} : vector<8x256xf32> to vector<1x256xf32>
    %c2_36 = arith.constant 2 : index
    %c3_37 = arith.constant 3 : index
    %106 = memref.load %arg3[%c2_36, %c3_37] : memref<4x8xf32, #tpu.memory_space<smem>>
    %107 = vector.broadcast %106 : f32 to vector<1x256xf32>
    %108 = arith.mulf %105, %107 : vector<1x256xf32>
    %109 = arith.addf %104, %108 : vector<1x256xf32>
    %110 = vector.extract_strided_slice %3 {offsets = [4, 0], sizes = [1, 256], strides = [1, 1]} : vector<8x256xf32> to vector<1x256xf32>
    %c2_38 = arith.constant 2 : index
    %c4_39 = arith.constant 4 : index
    %111 = memref.load %arg3[%c2_38, %c4_39] : memref<4x8xf32, #tpu.memory_space<smem>>
    %112 = vector.broadcast %111 : f32 to vector<1x256xf32>
    %113 = arith.mulf %110, %112 : vector<1x256xf32>
    %114 = arith.addf %109, %113 : vector<1x256xf32>
    %115 = vector.extract_strided_slice %3 {offsets = [5, 0], sizes = [1, 256], strides = [1, 1]} : vector<8x256xf32> to vector<1x256xf32>
    %c2_40 = arith.constant 2 : index
    %c5_41 = arith.constant 5 : index
    %116 = memref.load %arg3[%c2_40, %c5_41] : memref<4x8xf32, #tpu.memory_space<smem>>
    %117 = vector.broadcast %116 : f32 to vector<1x256xf32>
    %118 = arith.mulf %115, %117 : vector<1x256xf32>
    %119 = arith.addf %114, %118 : vector<1x256xf32>
    %120 = vector.extract_strided_slice %3 {offsets = [6, 0], sizes = [1, 256], strides = [1, 1]} : vector<8x256xf32> to vector<1x256xf32>
    %c2_42 = arith.constant 2 : index
    %c6_43 = arith.constant 6 : index
    %121 = memref.load %arg3[%c2_42, %c6_43] : memref<4x8xf32, #tpu.memory_space<smem>>
    %122 = vector.broadcast %121 : f32 to vector<1x256xf32>
    %123 = arith.mulf %120, %122 : vector<1x256xf32>
    %124 = arith.addf %119, %123 : vector<1x256xf32>
    %125 = vector.extract_strided_slice %3 {offsets = [7, 0], sizes = [1, 256], strides = [1, 1]} : vector<8x256xf32> to vector<1x256xf32>
    %c2_44 = arith.constant 2 : index
    %c7_45 = arith.constant 7 : index
    %126 = memref.load %arg3[%c2_44, %c7_45] : memref<4x8xf32, #tpu.memory_space<smem>>
    %127 = vector.broadcast %126 : f32 to vector<1x256xf32>
    %128 = arith.mulf %125, %127 : vector<1x256xf32>
    %129 = arith.addf %124, %128 : vector<1x256xf32>
    %130 = vector.extract_strided_slice %3 {offsets = [0, 0], sizes = [1, 256], strides = [1, 1]} : vector<8x256xf32> to vector<1x256xf32>
    %c3_46 = arith.constant 3 : index
    %c0_47 = arith.constant 0 : index
    %131 = memref.load %arg3[%c3_46, %c0_47] : memref<4x8xf32, #tpu.memory_space<smem>>
    %132 = vector.broadcast %131 : f32 to vector<1x256xf32>
    %133 = arith.mulf %130, %132 : vector<1x256xf32>
    %c3_48 = arith.constant 3 : index
    %134 = memref.load %arg4[%c3_48] : memref<4xf32, #tpu.memory_space<smem>>
    %135 = vector.broadcast %134 : f32 to vector<1x256xf32>
    %136 = arith.addf %133, %135 : vector<1x256xf32>
    %137 = vector.extract_strided_slice %3 {offsets = [1, 0], sizes = [1, 256], strides = [1, 1]} : vector<8x256xf32> to vector<1x256xf32>
    %c3_49 = arith.constant 3 : index
    %c1_50 = arith.constant 1 : index
    %138 = memref.load %arg3[%c3_49, %c1_50] : memref<4x8xf32, #tpu.memory_space<smem>>
    %139 = vector.broadcast %138 : f32 to vector<1x256xf32>
    %140 = arith.mulf %137, %139 : vector<1x256xf32>
    %141 = arith.addf %136, %140 : vector<1x256xf32>
    %142 = vector.extract_strided_slice %3 {offsets = [2, 0], sizes = [1, 256], strides = [1, 1]} : vector<8x256xf32> to vector<1x256xf32>
    %c3_51 = arith.constant 3 : index
    %c2_52 = arith.constant 2 : index
    %143 = memref.load %arg3[%c3_51, %c2_52] : memref<4x8xf32, #tpu.memory_space<smem>>
    %144 = vector.broadcast %143 : f32 to vector<1x256xf32>
    %145 = arith.mulf %142, %144 : vector<1x256xf32>
    %146 = arith.addf %141, %145 : vector<1x256xf32>
    %147 = vector.extract_strided_slice %3 {offsets = [3, 0], sizes = [1, 256], strides = [1, 1]} : vector<8x256xf32> to vector<1x256xf32>
    %c3_53 = arith.constant 3 : index
    %c3_54 = arith.constant 3 : index
    %148 = memref.load %arg3[%c3_53, %c3_54] : memref<4x8xf32, #tpu.memory_space<smem>>
    %149 = vector.broadcast %148 : f32 to vector<1x256xf32>
    %150 = arith.mulf %147, %149 : vector<1x256xf32>
    %151 = arith.addf %146, %150 : vector<1x256xf32>
    %152 = vector.extract_strided_slice %3 {offsets = [4, 0], sizes = [1, 256], strides = [1, 1]} : vector<8x256xf32> to vector<1x256xf32>
    %c3_55 = arith.constant 3 : index
    %c4_56 = arith.constant 4 : index
    %153 = memref.load %arg3[%c3_55, %c4_56] : memref<4x8xf32, #tpu.memory_space<smem>>
    %154 = vector.broadcast %153 : f32 to vector<1x256xf32>
    %155 = arith.mulf %152, %154 : vector<1x256xf32>
    %156 = arith.addf %151, %155 : vector<1x256xf32>
    %157 = vector.extract_strided_slice %3 {offsets = [5, 0], sizes = [1, 256], strides = [1, 1]} : vector<8x256xf32> to vector<1x256xf32>
    %c3_57 = arith.constant 3 : index
    %c5_58 = arith.constant 5 : index
    %158 = memref.load %arg3[%c3_57, %c5_58] : memref<4x8xf32, #tpu.memory_space<smem>>
    %159 = vector.broadcast %158 : f32 to vector<1x256xf32>
    %160 = arith.mulf %157, %159 : vector<1x256xf32>
    %161 = arith.addf %156, %160 : vector<1x256xf32>
    %162 = vector.extract_strided_slice %3 {offsets = [6, 0], sizes = [1, 256], strides = [1, 1]} : vector<8x256xf32> to vector<1x256xf32>
    %c3_59 = arith.constant 3 : index
    %c6_60 = arith.constant 6 : index
    %163 = memref.load %arg3[%c3_59, %c6_60] : memref<4x8xf32, #tpu.memory_space<smem>>
    %164 = vector.broadcast %163 : f32 to vector<1x256xf32>
    %165 = arith.mulf %162, %164 : vector<1x256xf32>
    %166 = arith.addf %161, %165 : vector<1x256xf32>
    %167 = vector.extract_strided_slice %3 {offsets = [7, 0], sizes = [1, 256], strides = [1, 1]} : vector<8x256xf32> to vector<1x256xf32>
    %c3_61 = arith.constant 3 : index
    %c7_62 = arith.constant 7 : index
    %168 = memref.load %arg3[%c3_61, %c7_62] : memref<4x8xf32, #tpu.memory_space<smem>>
    %169 = vector.broadcast %168 : f32 to vector<1x256xf32>
    %170 = arith.mulf %167, %169 : vector<1x256xf32>
    %171 = arith.addf %166, %170 : vector<1x256xf32>
    %c0_63 = arith.constant 0 : index
    %c0_64 = arith.constant 0 : index
    %172 = vector.load %arg2[%c0_63, %c0_64] : memref<2x256xi32, #tpu.memory_space<vmem>>, vector<1x256xi32>
    %c1_65 = arith.constant 1 : index
    %c0_66 = arith.constant 0 : index
    %173 = vector.load %arg2[%c1_65, %c0_66] : memref<2x256xi32, #tpu.memory_space<vmem>>, vector<1x256xi32>
    %c1_i32 = arith.constant 1 : i32
    %174 = vector.broadcast %c1_i32 : i32 to vector<1x256xi32>
    %175 = arith.cmpi sge, %172, %174 : vector<1x256xi32>
    %c15_i32 = arith.constant 15 : i32
    %176 = vector.broadcast %c15_i32 : i32 to vector<1x256xi32>
    %177 = arith.cmpi slt, %172, %176 : vector<1x256xi32>
    %c1_i32_67 = arith.constant 1 : i32
    %178 = vector.broadcast %c1_i32_67 : i32 to vector<1x256xi32>
    %179 = arith.cmpi sge, %173, %178 : vector<1x256xi32>
    %c15_i32_68 = arith.constant 15 : i32
    %180 = vector.broadcast %c15_i32_68 : i32 to vector<1x256xi32>
    %181 = arith.cmpi slt, %173, %180 : vector<1x256xi32>
    %c0_69 = arith.constant 0 : index
    %c0_70 = arith.constant 0 : index
    %182 = memref.load %arg5[%c0_69, %c0_70] : memref<9x4xf32, #tpu.memory_space<smem>>
    %183 = vector.broadcast %182 : f32 to vector<1x256xf32>
    %184 = arith.mulf %45, %183 : vector<1x256xf32>
    %c0_71 = arith.constant 0 : index
    %c1_72 = arith.constant 1 : index
    %185 = memref.load %arg5[%c0_71, %c1_72] : memref<9x4xf32, #tpu.memory_space<smem>>
    %186 = vector.broadcast %185 : f32 to vector<1x256xf32>
    %187 = arith.mulf %87, %186 : vector<1x256xf32>
    %188 = arith.addf %184, %187 : vector<1x256xf32>
    %c0_73 = arith.constant 0 : index
    %c2_74 = arith.constant 2 : index
    %189 = memref.load %arg5[%c0_73, %c2_74] : memref<9x4xf32, #tpu.memory_space<smem>>
    %190 = vector.broadcast %189 : f32 to vector<1x256xf32>
    %191 = arith.mulf %129, %190 : vector<1x256xf32>
    %192 = arith.addf %188, %191 : vector<1x256xf32>
    %c0_75 = arith.constant 0 : index
    %c3_76 = arith.constant 3 : index
    %193 = memref.load %arg5[%c0_75, %c3_76] : memref<9x4xf32, #tpu.memory_space<smem>>
    %194 = vector.broadcast %193 : f32 to vector<1x256xf32>
    %195 = arith.mulf %171, %194 : vector<1x256xf32>
    %196 = arith.addf %192, %195 : vector<1x256xf32>
    %c17_i32 = arith.constant 17 : i32
    %197 = tpu.dynamic_rotate %196 by %c17_i32 dim 1 : vector<1x256xf32>, i32 -> vector<1x256xf32>
    %198 = arith.andi %175, %179 : vector<1x256xi1>
    %cst_77 = arith.constant 0.000000e+00 : f32
    %199 = vector.broadcast %cst_77 : f32 to vector<1x256xf32>
    %200 = arith.select %198, %197, %199 : vector<1x256xi1>, vector<1x256xf32>
    %c1_78 = arith.constant 1 : index
    %c0_79 = arith.constant 0 : index
    %201 = memref.load %arg5[%c1_78, %c0_79] : memref<9x4xf32, #tpu.memory_space<smem>>
    %202 = vector.broadcast %201 : f32 to vector<1x256xf32>
    %203 = arith.mulf %45, %202 : vector<1x256xf32>
    %c1_80 = arith.constant 1 : index
    %c1_81 = arith.constant 1 : index
    %204 = memref.load %arg5[%c1_80, %c1_81] : memref<9x4xf32, #tpu.memory_space<smem>>
    %205 = vector.broadcast %204 : f32 to vector<1x256xf32>
    %206 = arith.mulf %87, %205 : vector<1x256xf32>
    %207 = arith.addf %203, %206 : vector<1x256xf32>
    %c1_82 = arith.constant 1 : index
    %c2_83 = arith.constant 2 : index
    %208 = memref.load %arg5[%c1_82, %c2_83] : memref<9x4xf32, #tpu.memory_space<smem>>
    %209 = vector.broadcast %208 : f32 to vector<1x256xf32>
    %210 = arith.mulf %129, %209 : vector<1x256xf32>
    %211 = arith.addf %207, %210 : vector<1x256xf32>
    %c1_84 = arith.constant 1 : index
    %c3_85 = arith.constant 3 : index
    %212 = memref.load %arg5[%c1_84, %c3_85] : memref<9x4xf32, #tpu.memory_space<smem>>
    %213 = vector.broadcast %212 : f32 to vector<1x256xf32>
    %214 = arith.mulf %171, %213 : vector<1x256xf32>
    %215 = arith.addf %211, %214 : vector<1x256xf32>
    %c16_i32 = arith.constant 16 : i32
    %216 = tpu.dynamic_rotate %215 by %c16_i32 dim 1 : vector<1x256xf32>, i32 -> vector<1x256xf32>
    %cst_86 = arith.constant 0.000000e+00 : f32
    %217 = vector.broadcast %cst_86 : f32 to vector<1x256xf32>
    %218 = arith.select %175, %216, %217 : vector<1x256xi1>, vector<1x256xf32>
    %219 = arith.addf %200, %218 : vector<1x256xf32>
    %c2_87 = arith.constant 2 : index
    %c0_88 = arith.constant 0 : index
    %220 = memref.load %arg5[%c2_87, %c0_88] : memref<9x4xf32, #tpu.memory_space<smem>>
    %221 = vector.broadcast %220 : f32 to vector<1x256xf32>
    %222 = arith.mulf %45, %221 : vector<1x256xf32>
    %c2_89 = arith.constant 2 : index
    %c1_90 = arith.constant 1 : index
    %223 = memref.load %arg5[%c2_89, %c1_90] : memref<9x4xf32, #tpu.memory_space<smem>>
    %224 = vector.broadcast %223 : f32 to vector<1x256xf32>
    %225 = arith.mulf %87, %224 : vector<1x256xf32>
    %226 = arith.addf %222, %225 : vector<1x256xf32>
    %c2_91 = arith.constant 2 : index
    %c2_92 = arith.constant 2 : index
    %227 = memref.load %arg5[%c2_91, %c2_92] : memref<9x4xf32, #tpu.memory_space<smem>>
    %228 = vector.broadcast %227 : f32 to vector<1x256xf32>
    %229 = arith.mulf %129, %228 : vector<1x256xf32>
    %230 = arith.addf %226, %229 : vector<1x256xf32>
    %c2_93 = arith.constant 2 : index
    %c3_94 = arith.constant 3 : index
    %231 = memref.load %arg5[%c2_93, %c3_94] : memref<9x4xf32, #tpu.memory_space<smem>>
    %232 = vector.broadcast %231 : f32 to vector<1x256xf32>
    %233 = arith.mulf %171, %232 : vector<1x256xf32>
    %234 = arith.addf %230, %233 : vector<1x256xf32>
    %c15_i32_95 = arith.constant 15 : i32
    %235 = tpu.dynamic_rotate %234 by %c15_i32_95 dim 1 : vector<1x256xf32>, i32 -> vector<1x256xf32>
    %236 = arith.andi %175, %181 : vector<1x256xi1>
    %cst_96 = arith.constant 0.000000e+00 : f32
    %237 = vector.broadcast %cst_96 : f32 to vector<1x256xf32>
    %238 = arith.select %236, %235, %237 : vector<1x256xi1>, vector<1x256xf32>
    %239 = arith.addf %219, %238 : vector<1x256xf32>
    %c3_97 = arith.constant 3 : index
    %c0_98 = arith.constant 0 : index
    %240 = memref.load %arg5[%c3_97, %c0_98] : memref<9x4xf32, #tpu.memory_space<smem>>
    %241 = vector.broadcast %240 : f32 to vector<1x256xf32>
    %242 = arith.mulf %45, %241 : vector<1x256xf32>
    %c3_99 = arith.constant 3 : index
    %c1_100 = arith.constant 1 : index
    %243 = memref.load %arg5[%c3_99, %c1_100] : memref<9x4xf32, #tpu.memory_space<smem>>
    %244 = vector.broadcast %243 : f32 to vector<1x256xf32>
    %245 = arith.mulf %87, %244 : vector<1x256xf32>
    %246 = arith.addf %242, %245 : vector<1x256xf32>
    %c3_101 = arith.constant 3 : index
    %c2_102 = arith.constant 2 : index
    %247 = memref.load %arg5[%c3_101, %c2_102] : memref<9x4xf32, #tpu.memory_space<smem>>
    %248 = vector.broadcast %247 : f32 to vector<1x256xf32>
    %249 = arith.mulf %129, %248 : vector<1x256xf32>
    %250 = arith.addf %246, %249 : vector<1x256xf32>
    %c3_103 = arith.constant 3 : index
    %c3_104 = arith.constant 3 : index
    %251 = memref.load %arg5[%c3_103, %c3_104] : memref<9x4xf32, #tpu.memory_space<smem>>
    %252 = vector.broadcast %251 : f32 to vector<1x256xf32>
    %253 = arith.mulf %171, %252 : vector<1x256xf32>
    %254 = arith.addf %250, %253 : vector<1x256xf32>
    %c1_i32_105 = arith.constant 1 : i32
    %255 = tpu.dynamic_rotate %254 by %c1_i32_105 dim 1 : vector<1x256xf32>, i32 -> vector<1x256xf32>
    %cst_106 = arith.constant 0.000000e+00 : f32
    %256 = vector.broadcast %cst_106 : f32 to vector<1x256xf32>
    %257 = arith.select %179, %255, %256 : vector<1x256xi1>, vector<1x256xf32>
    %258 = arith.addf %239, %257 : vector<1x256xf32>
    %c4_107 = arith.constant 4 : index
    %c0_108 = arith.constant 0 : index
    %259 = memref.load %arg5[%c4_107, %c0_108] : memref<9x4xf32, #tpu.memory_space<smem>>
    %260 = vector.broadcast %259 : f32 to vector<1x256xf32>
    %261 = arith.mulf %45, %260 : vector<1x256xf32>
    %c4_109 = arith.constant 4 : index
    %c1_110 = arith.constant 1 : index
    %262 = memref.load %arg5[%c4_109, %c1_110] : memref<9x4xf32, #tpu.memory_space<smem>>
    %263 = vector.broadcast %262 : f32 to vector<1x256xf32>
    %264 = arith.mulf %87, %263 : vector<1x256xf32>
    %265 = arith.addf %261, %264 : vector<1x256xf32>
    %c4_111 = arith.constant 4 : index
    %c2_112 = arith.constant 2 : index
    %266 = memref.load %arg5[%c4_111, %c2_112] : memref<9x4xf32, #tpu.memory_space<smem>>
    %267 = vector.broadcast %266 : f32 to vector<1x256xf32>
    %268 = arith.mulf %129, %267 : vector<1x256xf32>
    %269 = arith.addf %265, %268 : vector<1x256xf32>
    %c4_113 = arith.constant 4 : index
    %c3_114 = arith.constant 3 : index
    %270 = memref.load %arg5[%c4_113, %c3_114] : memref<9x4xf32, #tpu.memory_space<smem>>
    %271 = vector.broadcast %270 : f32 to vector<1x256xf32>
    %272 = arith.mulf %171, %271 : vector<1x256xf32>
    %273 = arith.addf %269, %272 : vector<1x256xf32>
    %274 = arith.addf %258, %273 : vector<1x256xf32>
    %c5_115 = arith.constant 5 : index
    %c0_116 = arith.constant 0 : index
    %275 = memref.load %arg5[%c5_115, %c0_116] : memref<9x4xf32, #tpu.memory_space<smem>>
    %276 = vector.broadcast %275 : f32 to vector<1x256xf32>
    %277 = arith.mulf %45, %276 : vector<1x256xf32>
    %c5_117 = arith.constant 5 : index
    %c1_118 = arith.constant 1 : index
    %278 = memref.load %arg5[%c5_117, %c1_118] : memref<9x4xf32, #tpu.memory_space<smem>>
    %279 = vector.broadcast %278 : f32 to vector<1x256xf32>
    %280 = arith.mulf %87, %279 : vector<1x256xf32>
    %281 = arith.addf %277, %280 : vector<1x256xf32>
    %c5_119 = arith.constant 5 : index
    %c2_120 = arith.constant 2 : index
    %282 = memref.load %arg5[%c5_119, %c2_120] : memref<9x4xf32, #tpu.memory_space<smem>>
    %283 = vector.broadcast %282 : f32 to vector<1x256xf32>
    %284 = arith.mulf %129, %283 : vector<1x256xf32>
    %285 = arith.addf %281, %284 : vector<1x256xf32>
    %c5_121 = arith.constant 5 : index
    %c3_122 = arith.constant 3 : index
    %286 = memref.load %arg5[%c5_121, %c3_122] : memref<9x4xf32, #tpu.memory_space<smem>>
    %287 = vector.broadcast %286 : f32 to vector<1x256xf32>
    %288 = arith.mulf %171, %287 : vector<1x256xf32>
    %289 = arith.addf %285, %288 : vector<1x256xf32>
    %c255_i32 = arith.constant 255 : i32
    %290 = tpu.dynamic_rotate %289 by %c255_i32 dim 1 : vector<1x256xf32>, i32 -> vector<1x256xf32>
    %cst_123 = arith.constant 0.000000e+00 : f32
    %291 = vector.broadcast %cst_123 : f32 to vector<1x256xf32>
    %292 = arith.select %181, %290, %291 : vector<1x256xi1>, vector<1x256xf32>
    %293 = arith.addf %274, %292 : vector<1x256xf32>
    %c6_124 = arith.constant 6 : index
    %c0_125 = arith.constant 0 : index
    %294 = memref.load %arg5[%c6_124, %c0_125] : memref<9x4xf32, #tpu.memory_space<smem>>
    %295 = vector.broadcast %294 : f32 to vector<1x256xf32>
    %296 = arith.mulf %45, %295 : vector<1x256xf32>
    %c6_126 = arith.constant 6 : index
    %c1_127 = arith.constant 1 : index
    %297 = memref.load %arg5[%c6_126, %c1_127] : memref<9x4xf32, #tpu.memory_space<smem>>
    %298 = vector.broadcast %297 : f32 to vector<1x256xf32>
    %299 = arith.mulf %87, %298 : vector<1x256xf32>
    %300 = arith.addf %296, %299 : vector<1x256xf32>
    %c6_128 = arith.constant 6 : index
    %c2_129 = arith.constant 2 : index
    %301 = memref.load %arg5[%c6_128, %c2_129] : memref<9x4xf32, #tpu.memory_space<smem>>
    %302 = vector.broadcast %301 : f32 to vector<1x256xf32>
    %303 = arith.mulf %129, %302 : vector<1x256xf32>
    %304 = arith.addf %300, %303 : vector<1x256xf32>
    %c6_130 = arith.constant 6 : index
    %c3_131 = arith.constant 3 : index
    %305 = memref.load %arg5[%c6_130, %c3_131] : memref<9x4xf32, #tpu.memory_space<smem>>
    %306 = vector.broadcast %305 : f32 to vector<1x256xf32>
    %307 = arith.mulf %171, %306 : vector<1x256xf32>
    %308 = arith.addf %304, %307 : vector<1x256xf32>
    %c241_i32 = arith.constant 241 : i32
    %309 = tpu.dynamic_rotate %308 by %c241_i32 dim 1 : vector<1x256xf32>, i32 -> vector<1x256xf32>
    %310 = arith.andi %177, %179 : vector<1x256xi1>
    %cst_132 = arith.constant 0.000000e+00 : f32
    %311 = vector.broadcast %cst_132 : f32 to vector<1x256xf32>
    %312 = arith.select %310, %309, %311 : vector<1x256xi1>, vector<1x256xf32>
    %313 = arith.addf %293, %312 : vector<1x256xf32>
    %c7_133 = arith.constant 7 : index
    %c0_134 = arith.constant 0 : index
    %314 = memref.load %arg5[%c7_133, %c0_134] : memref<9x4xf32, #tpu.memory_space<smem>>
    %315 = vector.broadcast %314 : f32 to vector<1x256xf32>
    %316 = arith.mulf %45, %315 : vector<1x256xf32>
    %c7_135 = arith.constant 7 : index
    %c1_136 = arith.constant 1 : index
    %317 = memref.load %arg5[%c7_135, %c1_136] : memref<9x4xf32, #tpu.memory_space<smem>>
    %318 = vector.broadcast %317 : f32 to vector<1x256xf32>
    %319 = arith.mulf %87, %318 : vector<1x256xf32>
    %320 = arith.addf %316, %319 : vector<1x256xf32>
    %c7_137 = arith.constant 7 : index
    %c2_138 = arith.constant 2 : index
    %321 = memref.load %arg5[%c7_137, %c2_138] : memref<9x4xf32, #tpu.memory_space<smem>>
    %322 = vector.broadcast %321 : f32 to vector<1x256xf32>
    %323 = arith.mulf %129, %322 : vector<1x256xf32>
    %324 = arith.addf %320, %323 : vector<1x256xf32>
    %c7_139 = arith.constant 7 : index
    %c3_140 = arith.constant 3 : index
    %325 = memref.load %arg5[%c7_139, %c3_140] : memref<9x4xf32, #tpu.memory_space<smem>>
    %326 = vector.broadcast %325 : f32 to vector<1x256xf32>
    %327 = arith.mulf %171, %326 : vector<1x256xf32>
    %328 = arith.addf %324, %327 : vector<1x256xf32>
    %c240_i32 = arith.constant 240 : i32
    %329 = tpu.dynamic_rotate %328 by %c240_i32 dim 1 : vector<1x256xf32>, i32 -> vector<1x256xf32>
    %cst_141 = arith.constant 0.000000e+00 : f32
    %330 = vector.broadcast %cst_141 : f32 to vector<1x256xf32>
    %331 = arith.select %177, %329, %330 : vector<1x256xi1>, vector<1x256xf32>
    %332 = arith.addf %313, %331 : vector<1x256xf32>
    %c8 = arith.constant 8 : index
    %c0_142 = arith.constant 0 : index
    %333 = memref.load %arg5[%c8, %c0_142] : memref<9x4xf32, #tpu.memory_space<smem>>
    %334 = vector.broadcast %333 : f32 to vector<1x256xf32>
    %335 = arith.mulf %45, %334 : vector<1x256xf32>
    %c8_143 = arith.constant 8 : index
    %c1_144 = arith.constant 1 : index
    %336 = memref.load %arg5[%c8_143, %c1_144] : memref<9x4xf32, #tpu.memory_space<smem>>
    %337 = vector.broadcast %336 : f32 to vector<1x256xf32>
    %338 = arith.mulf %87, %337 : vector<1x256xf32>
    %339 = arith.addf %335, %338 : vector<1x256xf32>
    %c8_145 = arith.constant 8 : index
    %c2_146 = arith.constant 2 : index
    %340 = memref.load %arg5[%c8_145, %c2_146] : memref<9x4xf32, #tpu.memory_space<smem>>
    %341 = vector.broadcast %340 : f32 to vector<1x256xf32>
    %342 = arith.mulf %129, %341 : vector<1x256xf32>
    %343 = arith.addf %339, %342 : vector<1x256xf32>
    %c8_147 = arith.constant 8 : index
    %c3_148 = arith.constant 3 : index
    %344 = memref.load %arg5[%c8_147, %c3_148] : memref<9x4xf32, #tpu.memory_space<smem>>
    %345 = vector.broadcast %344 : f32 to vector<1x256xf32>
    %346 = arith.mulf %171, %345 : vector<1x256xf32>
    %347 = arith.addf %343, %346 : vector<1x256xf32>
    %c239_i32 = arith.constant 239 : i32
    %348 = tpu.dynamic_rotate %347 by %c239_i32 dim 1 : vector<1x256xf32>, i32 -> vector<1x256xf32>
    %349 = arith.andi %177, %181 : vector<1x256xi1>
    %cst_149 = arith.constant 0.000000e+00 : f32
    %350 = vector.broadcast %cst_149 : f32 to vector<1x256xf32>
    %351 = arith.select %349, %348, %350 : vector<1x256xi1>, vector<1x256xf32>
    %352 = arith.addf %332, %351 : vector<1x256xf32>
    %353 = arith.negf %352 : vector<1x256xf32>
    %354 = math.exp %353 : vector<1x256xf32>
    %cst_150 = arith.constant 1.000000e+00 : f32
    %355 = vector.broadcast %cst_150 : f32 to vector<1x256xf32>
    %356 = arith.addf %355, %354 : vector<1x256xf32>
    %357 = arith.divf %355, %356 : vector<1x256xf32>
    %358 = vector.broadcast %357 : vector<1x256xf32> to vector<8x256xf32>
    %359 = arith.mulf %1, %358 : vector<8x256xf32>
    %c0_151 = arith.constant 0 : index
    %c0_152 = arith.constant 0 : index
    %c0_153 = arith.constant 0 : index
    %360 = vector.load %arg6[%c0_151, %c0_152, %c0_153] : memref<1x8x256xf32, #tpu.memory_space<vmem>>, vector<1x8x256xf32>
    %361 = vector.shape_cast %360 : vector<1x8x256xf32> to vector<8x256xf32>
    %362 = vector.shape_cast %359 : vector<8x256xf32> to vector<1x8x256xf32>
    tpu.vector_store %arg6[%c0_151, %c0_152, %c0_153], %362 {strides = array<i32>} : memref<1x8x256xf32, #tpu.memory_space<vmem>>, vector<1x8x256xf32>,
    return
  }
  func.func @transform_0(%arg0: i32) -> (i32, i32, i32) {
    %c0_i32 = arith.constant 0 : i32
    %c0_i32_0 = arith.constant 0 : i32
    %c0_i32_1 = arith.constant 0 : i32
    return %arg0, %c0_i32, %c0_i32_0 : i32, i32, i32
  }
  func.func @transform_1(%arg0: i32) -> (i32, i32) {
    %c0_i32 = arith.constant 0 : i32
    %c0_i32_0 = arith.constant 0 : i32
    %c0_i32_1 = arith.constant 0 : i32
    return %c0_i32, %c0_i32_0 : i32, i32
  }
  func.func @transform_2(%arg0: i32) -> (i32, i32) {
    %c0_i32 = arith.constant 0 : i32
    %c0_i32_0 = arith.constant 0 : i32
    %c0_i32_1 = arith.constant 0 : i32
    return %c0_i32, %c0_i32_0 : i32, i32
  }
  func.func @transform_3(%arg0: i32) -> i32 {
    %c0_i32 = arith.constant 0 : i32
    %c0_i32_0 = arith.constant 0 : i32
    return %c0_i32 : i32
  }
  func.func @transform_4(%arg0: i32) -> (i32, i32) {
    %c0_i32 = arith.constant 0 : i32
    %c0_i32_0 = arith.constant 0 : i32
    %c0_i32_1 = arith.constant 0 : i32
    return %c0_i32, %c0_i32_0 : i32, i32
  }
  func.func @transform_5(%arg0: i32) -> (i32, i32, i32) {
    %c0_i32 = arith.constant 0 : i32
    %c0_i32_0 = arith.constant 0 : i32
    %c0_i32_1 = arith.constant 0 : i32
    return %arg0, %c0_i32, %c0_i32_0 : i32, i32, i32
  }
}

</mosaic_0001>

<bundles_post_ra>
// kernel: tpu_custom_call.1
= control target key start
LH: loop header
LB: loop body
LE: loop exit
PB: predicated region body
PF: predicated region fallthrough
CT: control target
= control target key end

     0   :  { %10 = vsyncpa [#allocation3], 0  ;;  %s2124_s0 = inlined_call_operand.hbm [shape: f32[2,8,256], index: 0, kind: input, shape index: {}]   ;;  %s2125_s1 = inlined_call_operand.vmem [shape: s32[2,256], index: 1, kind: input, shape index: {}]   ;;  %s2126_s2 = inlined_call_operand.vmem [shape: f32[4,8], index: 2, kind: input, shape index: {}]   ;;  %s2127_s3 = inlined_call_operand.vmem [shape: f32[4], index: 3, kind: input, shape index: {}]   ;;  %s2128_s4 = inlined_call_operand.vmem [shape: f32[9,4], index: 4, kind: input, shape index: {}]   ;;  %s2129_s5 = inlined_call_operand.hbm [shape: f32[2,8,256], index: 5, kind: output, shape index: {}]  }
   0x1   :  { %12 = vsyncpa [#allocation3 + $0x1], 0 }
   0x2   :  { %13 = vsyncpa [#allocation5], 0 }
   0x3   :  { %14 = vsyncpa [#allocation8], 0 }
   0x4   :  { %15 = vsyncpa [#allocation4], 0 }
   0x5   :  { %17 = vsyncpa [#allocation4 + $0x1], 0  ;;  %s1511_s18 = smov 0   ;;  %s1513_s19 = smov 0  }
   0x6   :  { %s1515_s20 = smov 0   ;;  %s1517_s21 = smov 0  }
   0x7 LB: > { %s1532_s22 = sadd.s32 4294967295, %s1466_s21   ;;  %s1131_s23 = sadd.s32 4294967294, %s1466_s21   ;;  %s1466_s21 = sphi %s1517_s21, %s2145_s21   ;;  %s1462_s20 = sphi %s1515_s20, %s2144_s20   ;;  %s1458_s19 = sphi %s1513_s19, %s2143_s19   ;;  %s1454_s18 = sphi %s1511_s18, %s2142_s18  }
   0x8   : > { %p43_p0 = scmp.ne.s32.totalorder %s1458_s19, %s1454_s18  ;;  %p44_p1 = scmp.eq.s32.totalorder %s1532_s22, 0 }
   0x9   : > { %p151_p2 = scmp.eq.s32.totalorder %s1532_s22, 1  ;;  %p157_p3 = scmp.eq.s32.totalorder %s1131_s23, 1 }
   0xa   : > { %p1541_p4 = por %p44_p1, %p43_p0  ;;  %p1132_p5 = scmp.ge.s32.totalorder %s1466_s21, 1 }
   0xb   : > { %p1546_p6 = por %p157_p3, %p43_p0  ;;  %p164_p7 = scmp.lt.s32.totalorder %s1466_s21, 3 }
   0xc   : > { %s189_s28 = sshll.u32 %s2127_s3, 4  ;;  %s179_s7 = sshll.u32 %s2126_s2, 4  ;;  %s190_s28 = int_to_ptr.vmem [resolvable:$true] %s189_s28  ;;  %s180_s7 = int_to_ptr.vmem [resolvable:$true] %s179_s7 }
   0xd   : > { %p1554_p8 = pnand %p1132_p5, %p164_p7  ;;  %s198_s10 = sshll.u32 %s2128_s4, 4  ;;  %s199_s10 = int_to_ptr.vmem [resolvable:$true] %s198_s10 }
   0xe   : > { %s1468_s11 = smov [#allocation7]   ;;  %s1469_s12 = smov [#allocation6]  }
   0xf   : > { %p1240_p10 = pneg %p1554_p8  ;;  %s1470_s13 = smov [#allocation9]  }
  0x10   : > { %s1471_s14 = smov 128   ;;  %s1472_s15 = smov 8  }
  0x11   : > { %p1241_p11 = pnand %p1240_p10, %p44_p1  ;;  %s1570_s16 = sadd.s32 1, %s1466_s21  }
  0x12   : > { %s27_s17 = ssub.s32 %s1466_s21, %s1570_s16  ;;  %s30_s23 = sadd.s32 1, %s1462_s20 }
  0x13   : > { %1246 = dma.vmem_to_smem (!%p1241_p11), %s190_s28, 16, %s1468_s11, [#allocation8]  }
  0x14   : > { %1243 = dma.vmem_to_smem (!%p1241_p11), %s180_s7, 64, %s1469_s12, [#allocation5]  }
  0x15   : > { %1249 = dma.vmem_to_smem (!%p1241_p11), %s199_s10, 256, %s1470_s13, [#allocation8], %s1471_s14, %s1471_s14, %s1472_s15  }
  0x16   : > { %p28_p12 = scmp.eq.s32.totalorder %s27_s17, 0  ;;  %p37_p13 = scmp.ne.s32.totalorder %s1462_s20, %s1458_s19 }
  0x17   : > { %p38_p0 = scmp.eq.s32.totalorder %s1466_s21, 0  ;;  %p1261_p5 = scmp.lt.s32.totalorder %s1466_s21, 2 }
  0x18   : > { %s1579_s26 = scalar_select %p28_p12, %s1462_s20, %s30_s23  }
  0x19   : > { %p1583_p3 = por %p151_p2, %p37_p13  ;;  %s212_s28 = sand.u32 1, %s1462_s20  }
  0x1a   : > { %s1222_s30 = sshll.u32 %s1466_s21, 4  ;;  %p39_p7 = por %p38_p0, %p37_p13 }
  0x1b   : > { %s1137_s6 = sshll.u32 %s212_s28, 4  ;;  %s221_s9 = scalar_lea.hbm %s2124_s0, %s1222_s30 }
  0x1c   : > { %s223_s10 = sshll.u32 %s221_s9, 4  ;;  %s216_s11 = scalar_lea.vmem [#allocation2], %s1137_s6  ;;  %s224_s10 = int_to_ptr.hbm [resolvable:$true] %s223_s10 }
  0x1d   : > { %s225_s12 = sshll.u32 %s216_s11, 4  ;;  %p1593_p10 = pnand %p1261_p5, %p39_p7  ;;  %s226_s12 = int_to_ptr.vmem [resolvable:$true] %s225_s12 }
  0x1e   : > { %s213_s14 = scalar_lea.sflag [#allocation3], %s212_s28  ;;  %s1362_s15 = sshra.s32 %s224_s10, 4  ;;  %s1363_s15 = int_to_ptr.hbm [resolvable:$true] %s1362_s15 }
  0x1f   : > { %s1364_s17 = scalar_lea.hbm %s1363_s15, 16  ;;  %p1366_p11 = pneg %p1593_p10 }
  0x20   : > { %p1365_p2 = scmp.ne.s32.totalorder %s1363_s15, %s1364_s17  ;;  %s1369_s6 = scalar_lea.hbm %s2124_s0, 32 }
  0x21   : > { %p1370_p0 = scmp.lt.s32.totalorder %s1363_s15, %s2124_s0  ;;  %p1371_p5 = scmp.lt.s32.totalorder %s1369_s6, %s1364_s17 }
  0x22   : > { %p1367_p12 = pnand %p1366_p11, %p1365_p2 }
  0x23   : > { %p1372_p7 = por %p1371_p5, %p1370_p0 }
  0x24   : > { %p1368_p13 = pneg %p1367_p12 }
  0x26   : > { %p1373_p9 = pnand %p1372_p7, %p1368_p13 }
  0x28   : > { %1376 = shalt.err (!%p1373_p9)
}
  0x29   : > { %1253 = dma.hbm_to_vmem [thread:$0]  (!%p1593_p10), %s224_s10, 256, %s226_s12, %s213_s14  }
  0x2a   : > { %234 = sbr.rel (%p1554_p8) target bundleno = 327 (0x147), region = 40  ;;  %s1610_s28 = sand.u32 (!%p1554_p8), 1, %s1458_s19  }
  0x2b   : > { %s2130_s9 = sshll.u32 (!%p1554_p8), %s1610_s28, 4  ;;  %s237_s11 = scalar_lea.sflag (!%p1554_p8), [#allocation3], %s1610_s28 }
  0x2c   : > { %s1616_s15 = scalar_lea.vmem (!%p1554_p8), [#allocation2], %s2130_s9 }
  0x2f   : > { %1437 = dma.done.wait (%p1541_p4), %s237_s11, 256  }
  0x30   : > { %1439 = vsyncadd (%p1541_p4), %s237_s11, 4294967040 }
  0x31   : > { %1441 = dma.done.wait (%p44_p1), [#allocation5], 64  }
  0x32   : > { %1443 = vsyncadd (%p44_p1), [#allocation5], 4294967232 }
  0x33   : > { %1445 = dma.done.wait (%p44_p1), [#allocation8], 272  }
  0x34   : > { %1447 = vsyncadd (%p44_p1), [#allocation8], 4294967024 }
  0x35   : > { %261 = sfence }
  0x36   : > { %v284_v0 = vld [vmem:[%s1616_s15] sm:$0xff]  ;;  %v285_v1 = vld [vmem:[%s1616_s15 + $0x8] sm:$0xff]  ;;  %s288_s29 = sld [smem:[#allocation6]]  ;;  %vm698_vm6 = vcmask 1040384  }
  0x37   : > { %s292_s24 = sld [smem:[#allocation7]]  ;;  %v1632_v2 = vmax.f32 %v284_v0, 0.0  ;;  %v1634_v3 = vmax.f32 %v285_v1, 0.0 }
  0x38   : > { %s1146_s10 = sld [smem:[#allocation6 + $0x1]] }
  0x39   : > { %s1147_s12 = sld [smem:[#allocation6 + $0x2]] }
  0x3a   : > { %s1148_s13 = sld [smem:[#allocation6 + $0x3]] }
  0x3b   : > { %s1636_s14 = sld [smem:[#allocation6 + $0x4]] }
  0x3c   : > { %v289_v4 = vstv %s288_s29  ;;  %s1638_s17 = sld [smem:[#allocation6 + $0x5]] }
  0x3d   : > { %v290_v5 = vmul.f32 %v289_v4, %v1632_v2  ;;  %v291_v6 = vmul.f32 %v289_v4, %v1634_v3  ;;  %v293_v7 = vstv %s292_s24  ;;  %s1642_s23 = sld [smem:[#allocation6 + $0x6]] }
  0x3e   : > { %v297_v8 = vstv %s1146_s10  ;;  %s1644_s30 = sld [smem:[#allocation6 + $0x7]] }
  0x3f   : > { %v294_v9 = vadd.f32 %v293_v7, %v290_v5  ;;  %v295_v10 = vadd.f32 %v293_v7, %v291_v6  ;;  %v298_v11 = vmul.f32 %v297_v8, %v1632_v2  ;;  %v299_v12 = vmul.f32 %v297_v8, %v1634_v3  ;;  %s1648_s6 = sld [smem:[#allocation6 + $0x80]] }
  0x40   : > { %v309_v13 = vstv %s1147_s12  ;;  %v321_v14 = vstv %s1148_s13  ;;  %s1652_s7 = sld [smem:[#allocation7 + $0x1]] }
  0x41   : > { %v302_v15 = vrot.slane %v298_v11, 1  ;;  %v303_v16 = vrot.slane %v299_v12, 1  ;;  %v310_v17 = vmul.f32 %v309_v13, %v1632_v2  ;;  %v311_v18 = vmul.f32 %v309_v13, %v1634_v3  ;;  %s1658_s8 = sld [smem:[#allocation6 + $0x81]] }
  0x42   : > { %v322_v19 = vmul.f32 %v321_v14, %v1632_v2  ;;  %v323_v20 = vmul.f32 %v321_v14, %v1634_v3  ;;  %v333_v21 = vstv %s1636_s14  ;;  %v345_v22 = vstv %s1638_s17  ;;  %s1660_s11 = sld [smem:[#allocation6 + $0x82]] }
  0x43   : > { %v306_v23 = vadd.f32 %v302_v15, %v294_v9  ;;  %v307_v24 = vadd.f32 %v303_v16, %v295_v10  ;;  %v314_v25 = vrot.slane %v310_v17, 2  ;;  %v315_v26 = vrot.slane %v311_v18, 2  ;;  %s1664_s29 = sld [smem:[#allocation6 + $0x83]] }
  0x44   : > { %v326_v27 = vrot.slane %v322_v19, 3  ;;  %v327_v28 = vrot.slane %v323_v20, 3  ;;  %v334_v29 = vmul.f32 %v333_v21, %v1632_v2  ;;  %v335_v30 = vmul.f32 %v333_v21, %v1634_v3  ;;  %s1668_s24 = sld [smem:[#allocation6 + $0x84]] }
  0x45   : > { %v318_v31 = vadd.f32 %v314_v25, %v306_v23  ;;  %v319_v32 = vadd.f32 %v315_v26, %v307_v24  ;;  %v346_v33 = vmul.f32 %v345_v22, %v1632_v2  ;;  %v347_v34 = vmul.f32 %v345_v22, %v1634_v3  ;;  %s1677_s10 = sld [smem:[#allocation6 + $0x85]] }
  0x46   : > { %v338_v35 = vrot.slane %v334_v29, 4  ;;  %v339_v36 = vrot.slane %v335_v30, 4  ;;  %v357_v37 = vstv %s1642_s23  ;;  %v369_v38 = vstv %s1644_s30  ;;  %s1680_s12 = sld [smem:[#allocation6 + $0x86]] }
  0x47   : > { %v330_v39 = vadd.f32 %v326_v27, %v318_v31  ;;  %v331_v40 = vadd.f32 %v327_v28, %v319_v32  ;;  %v350_v41 = vrot.slane %v346_v33, 5  ;;  %v351_v42 = vrot.slane %v347_v34, 5  ;;  %s1687_s13 = sld [smem:[#allocation6 + $0x87]] }
  0x48   : > { %v358_v43 = vmul.f32 %v357_v37, %v1632_v2  ;;  %v359_v44 = vmul.f32 %v357_v37, %v1634_v3  ;;  %v370_v45 = vmul.f32 %v369_v38, %v1632_v2  ;;  %v371_v46 = vmul.f32 %v369_v38, %v1634_v3  ;;  %s1690_s14 = sld [smem:[#allocation6 + $0x100]] }
  0x49   : > { %v342_v47 = vadd.f32 %v338_v35, %v330_v39  ;;  %v343_v48 = vadd.f32 %v339_v36, %v331_v40  ;;  %v381_v49 = vstv %s1648_s6  ;;  %v385_v53 = vstv %s1652_s7  ;;  %s1700_s17 = sld [smem:[#allocation7 + $0x2]] }
  0x4a   : > { %v362_v50 = vrot.slane %v358_v43, 6  ;;  %v363_v51 = vrot.slane %v359_v44, 6  ;;  %v374_v52 = vrot.slane %v370_v45, 7  ;;  %v382_v56 = vmul.f32 %v381_v49, %v1632_v2  ;;  %s1702_s23 = sld [smem:[#allocation6 + $0x101]] }
  0x4b   : > { %v354_v54 = vadd.f32 %v350_v41, %v342_v47  ;;  %v355_v55 = vadd.f32 %v351_v42, %v343_v48  ;;  %v383_v57 = vmul.f32 %v381_v49, %v1634_v3  ;;  %v375_v58 = vrot.slane %v371_v46, 7  ;;  %s1706_s30 = sld [smem:[#allocation6 + $0x102]] }
  0x4c   : > { %v389_v59 = vstv %s1658_s8  ;;  %v401_v60 = vstv %s1660_s11  ;;  %v413_v61 = vstv %s1664_s29  ;;  %v386_v63 = vadd.f32 %v385_v53, %v382_v56  ;;  %s1710_s6 = sld [smem:[#allocation6 + $0x103]] }
  0x4d   : > { %v366_v62 = vadd.f32 %v362_v50, %v354_v54  ;;  %v387_v0 = vadd.f32 %v385_v53, %v383_v57  ;;  %v425_v1 = vstv %s1668_s24  ;;  %v390_v4 = vmul.f32 %v389_v59, %v1632_v2  ;;  %s1716_s7 = sld [smem:[#allocation6 + $0x104]] }
  0x4e   : > { %v391_v5 = vmul.f32 %v389_v59, %v1634_v3  ;;  %v402_v6 = vmul.f32 %v401_v60, %v1632_v2  ;;  %v403_v7 = vmul.f32 %v401_v60, %v1634_v3  ;;  %v367_v8 = vadd.f32 %v363_v51, %v355_v55  ;;  %s1719_s8 = sld [smem:[#allocation6 + $0x105]] }
  0x4f   : > { %v1696_v9 = vadd.f32 %v374_v52, %v366_v62  ;;  %v414_v10 = vmul.f32 %v413_v61, %v1632_v2  ;;  %v415_v11 = vmul.f32 %v413_v61, %v1634_v3  ;;  %v394_v12 = vrot.slane %v390_v4, 1  ;;  %s1730_s11 = sld [smem:[#allocation6 + $0x106]] }
  0x50   : > { %v395_v13 = vrot.slane %v391_v5, 1  ;;  %v406_v14 = vrot.slane %v402_v6, 2  ;;  %v407_v15 = vrot.slane %v403_v7, 2  ;;  %v426_v18 = vmul.f32 %v425_v1, %v1632_v2  ;;  %s1732_s29 = sld [smem:[#allocation6 + $0x107]] }
  0x51   : > { %v418_v16 = vrot.slane %v414_v10, 3  ;;  %v419_v17 = vrot.slane %v415_v11, 3  ;;  %v427_v19 = vmul.f32 %v425_v1, %v1634_v3  ;;  %v398_v20 = vadd.f32 %v394_v12, %v386_v63  ;;  %s1740_s24 = sld [smem:[#allocation6 + $0x180]] }
  0x52   : > { %v399_v21 = vadd.f32 %v395_v13, %v387_v0  ;;  %v437_v22 = vstv %s1677_s10  ;;  %v449_v23 = vstv %s1680_s12  ;;  %v1712_v24 = vadd.f32 %v375_v58, %v367_v8  ;;  %s1746_s10 = sld [smem:[#allocation7 + $0x3]] }
  0x53   : > { %v430_v25 = vrot.slane %v426_v18, 4  ;;  %v438_v26 = vmul.f32 %v437_v22, %v1632_v2  ;;  %v439_v27 = vmul.f32 %v437_v22, %v1634_v3  ;;  %v410_v28 = vadd.f32 %v406_v14, %v398_v20  ;;  %s1750_s12 = sld [smem:[#allocation6 + $0x181]] }
  0x54   : > { %v411_v29 = vadd.f32 %v407_v15, %v399_v21  ;;  %v431_v30 = vrot.slane %v427_v19, 4  ;;  %v450_v31 = vmul.f32 %v449_v23, %v1632_v2  ;;  %v451_v33 = vmul.f32 %v449_v23, %v1634_v3  ;;  %s1887_s9 = sld [smem:[#allocation9 + $0x281]] }
  0x55   : > { %v442_v32 = vrot.slane %v438_v26, 5  ;;  %v461_v34 = vstv %s1687_s13  ;;  %v473_v35 = vstv %s1690_s14  ;;  %v422_v36 = vadd.f32 %v418_v16, %v410_v28  ;;  %s1752_s13 = sld [smem:[#allocation6 + $0x182]] }
  0x56   : > { %v423_v37 = vadd.f32 %v419_v17, %v411_v29  ;;  %v443_v38 = vrot.slane %v439_v27, 5  ;;  %v454_v39 = vrot.slane %v450_v31, 6  ;;  %v462_v40 = vmul.f32 %v461_v34, %v1632_v2  ;;  %s1760_s14 = sld [smem:[#allocation6 + $0x183]] }
  0x57   : > { %v463_v41 = vmul.f32 %v461_v34, %v1634_v3  ;;  %v474_v42 = vmul.f32 %v473_v35, %v1632_v2  ;;  %v475_v43 = vmul.f32 %v473_v35, %v1634_v3  ;;  %v434_v44 = vadd.f32 %v430_v25, %v422_v36 }
  0x58   : > { %v435_v45 = vadd.f32 %v431_v30, %v423_v37  ;;  %v477_v46 = vstv %s1700_s17  ;;  %v481_v47 = vstv %s1702_s23  ;;  %v455_v48 = vrot.slane %v451_v33, 6  ;;  %s1762_s17 = sld [smem:[#allocation6 + $0x184]] }
  0x59   : > { %v466_v49 = vrot.slane %v462_v40, 7  ;;  %v478_v50 = vadd.f32 %v477_v46, %v474_v42  ;;  %v479_v51 = vadd.f32 %v477_v46, %v475_v43  ;;  %v446_v52 = vadd.f32 %v442_v32, %v434_v44  ;;  %s1773_s23 = sld [smem:[#allocation6 + $0x185]] }
  0x5a   : > { %v447_v53 = vadd.f32 %v443_v38, %v435_v45  ;;  %v482_v54 = vmul.f32 %v481_v47, %v1632_v2  ;;  %v483_v55 = vmul.f32 %v481_v47, %v1634_v3  ;;  %v467_v56 = vrot.slane %v463_v41, 7 }
  0x5b   : > { %v493_v57 = vstv %s1706_s30  ;;  %v505_v58 = vstv %s1710_s6  ;;  %v517_v59 = vstv %s1716_s7  ;;  %v458_v60 = vadd.f32 %v454_v39, %v446_v52  ;;  %s1776_s30 = sld [smem:[#allocation6 + $0x186]] }
  0x5c   : > { %v486_v61 = vrot.slane %v482_v54, 1  ;;  %v487_v62 = vrot.slane %v483_v55, 1  ;;  %v529_v63 = vstv %s1719_s8  ;;  %v494_v0 = vmul.f32 %v493_v57, %v1632_v2  ;;  %s1784_s6 = sld [smem:[#allocation6 + $0x187]] }
  0x5d   : > { %v495_v1 = vmul.f32 %v493_v57, %v1634_v3  ;;  %v506_v4 = vmul.f32 %v505_v58, %v1632_v2  ;;  %v507_v5 = vmul.f32 %v505_v58, %v1634_v3  ;;  %v459_v6 = vadd.f32 %v455_v48, %v447_v53  ;;  %s1789_s7 = sld [smem:[#allocation9 + $0x80]] }
  0x5e   : > { %v1748_v7 = vadd.f32 %v466_v49, %v458_v60  ;;  %v490_v8 = vadd.f32 %v486_v61, %v478_v50  ;;  %v491_v10 = vadd.f32 %v487_v62, %v479_v51  ;;  %v498_v11 = vrot.slane %v494_v0, 2  ;;  %s1795_s8 = sld [smem:[#allocation9 + $0x81]] }
  0x5f   : > { %v499_v12 = vrot.slane %v495_v1, 2  ;;  %v510_v13 = vrot.slane %v506_v4, 3  ;;  %v511_v14 = vrot.slane %v507_v5, 3  ;;  %v518_v15 = vmul.f32 %v517_v59, %v1632_v2 }
  0x60   : > { %v519_v16 = vmul.f32 %v517_v59, %v1634_v3  ;;  %v530_v17 = vmul.f32 %v529_v63, %v1632_v2  ;;  %v531_v18 = vmul.f32 %v529_v63, %v1634_v3  ;;  %v502_v19 = vadd.f32 %v498_v11, %v490_v8 }
  0x61   : > { %v503_v20 = vadd.f32 %v499_v12, %v491_v10  ;;  %v541_v21 = vstv %s1730_s11  ;;  %v553_v22 = vstv %s1732_s29  ;;  %v522_v23 = vrot.slane %v518_v15, 4  ;;  %s1799_s11 = sld [smem:[#allocation9 + $0x82]] }
  0x62   : > { %v523_v25 = vrot.slane %v519_v16, 4  ;;  %v534_v26 = vrot.slane %v530_v17, 5  ;;  %v535_v27 = vrot.slane %v531_v18, 5  ;;  %v514_v28 = vadd.f32 %v510_v13, %v502_v19  ;;  %s1805_s29 = sld [smem:[#allocation9 + $0x83]] }
  0x63   : > { %v515_v29 = vadd.f32 %v511_v14, %v503_v20  ;;  %v542_v30 = vmul.f32 %v541_v21, %v1632_v2  ;;  %v543_v31 = vmul.f32 %v541_v21, %v1634_v3  ;;  %v1766_v32 = vadd.f32 %v467_v56, %v459_v6 }
  0x64   : > { %v554_v33 = vmul.f32 %v553_v22, %v1632_v2  ;;  %v1770_v34 = vmul.f32 %v553_v22, %v1634_v3  ;;  %v565_v35 = vstv %s1740_s24  ;;  %v526_v36 = vadd.f32 %v522_v23, %v514_v28  ;;  %s1807_s24 = sld [smem:[#allocation9]] }
  0x65   : > { %v527_v37 = vadd.f32 %v523_v25, %v515_v29  ;;  %v546_v38 = vrot.slane %v542_v30, 6  ;;  %v569_v39 = vstv %s1746_s10  ;;  %v547_v40 = vrot.slane %v543_v31, 6  ;;  %s1811_s10 = sld [smem:[#allocation9 + $0x1]] }
  0x66   : > { %v558_v41 = vrot.slane %v554_v33, 7  ;;  %v566_v42 = vmul.f32 %v565_v35, %v1632_v2  ;;  %v567_v43 = vmul.f32 %v565_v35, %v1634_v3  ;;  %v538_v44 = vadd.f32 %v534_v26, %v526_v36 }
  0x67   : > { %v539_v45 = vadd.f32 %v535_v27, %v527_v37  ;;  %v573_v46 = vstv %s1750_s12  ;;  %v585_v47 = vstv %s1752_s13  ;;  %v559_v53 = vrot.slane %v1770_v34, 7  ;;  %s1817_s12 = sld [smem:[#allocation9 + $0x2]] }
  0x68   : > { %v570_v48 = vadd.f32 %v569_v39, %v566_v42  ;;  %v571_v49 = vadd.f32 %v569_v39, %v567_v43  ;;  %v574_v50 = vmul.f32 %v573_v46, %v1632_v2  ;;  %v575_v51 = vmul.f32 %v573_v46, %v1634_v3  ;;  %s1819_s13 = sld [smem:[#allocation9 + $0x3]] }
  0x69   : > { %v550_v52 = vadd.f32 %v546_v38, %v538_v44  ;;  %v586_v54 = vmul.f32 %v585_v47, %v1632_v2  ;;  %v587_v55 = vmul.f32 %v585_v47, %v1634_v3  ;;  %v597_v58 = vstv %s1760_s14  ;;  %s1826_s14 = sld [smem:[#allocation9 + $0x180]] }
  0x6a   : > { %v578_v56 = vrot.slane %v574_v50, 1  ;;  %v579_v57 = vrot.slane %v575_v51, 1  ;;  %v609_v59 = vstv %s1762_s17  ;;  %v551_v60 = vadd.f32 %v547_v40, %v539_v45  ;;  %s1830_s17 = sld [smem:[#allocation9 + $0x181]] }
  0x6b   : > { %v1793_v61 = vadd.f32 %v558_v41, %v550_v52  ;;  %v590_v62 = vrot.slane %v586_v54, 2  ;;  %v591_v63 = vrot.slane %v587_v55, 2  ;;  %v598_v4 = vmul.f32 %v597_v58, %v1632_v2 }
  0x6c   : > { %v582_v0 = vadd.f32 %v578_v56, %v570_v48  ;;  %v583_v1 = vadd.f32 %v579_v57, %v571_v49  ;;  %v599_v5 = vmul.f32 %v597_v58, %v1634_v3  ;;  %v610_v6 = vmul.f32 %v609_v59, %v1632_v2 }
  0x6d   : > { %v611_v8 = vmul.f32 %v609_v59, %v1634_v3  ;;  %v621_v10 = vstv %s1773_s23  ;;  %v633_v11 = vstv %s1776_s30  ;;  %v602_v14 = vrot.slane %v598_v4, 3  ;;  %s1834_s23 = sld [smem:[#allocation9 + $0x182]] }
  0x6e   : > { %v594_v12 = vadd.f32 %v590_v62, %v582_v0  ;;  %v595_v13 = vadd.f32 %v591_v63, %v583_v1  ;;  %v603_v15 = vrot.slane %v599_v5, 3  ;;  %v614_v16 = vrot.slane %v610_v6, 4  ;;  %s1838_s30 = sld [smem:[#allocation9 + $0x183]] }
  0x6f   : > { %v615_v17 = vrot.slane %v611_v8, 4  ;;  %v622_v18 = vmul.f32 %v621_v10, %v1632_v2  ;;  %v623_v19 = vmul.f32 %v621_v10, %v1634_v3  ;;  %v634_v22 = vmul.f32 %v633_v11, %v1632_v2 }
  0x70   : > { %v606_v20 = vadd.f32 %v602_v14, %v594_v12  ;;  %v607_v21 = vadd.f32 %v603_v15, %v595_v13  ;;  %v635_v23 = vmul.f32 %v633_v11, %v1634_v3  ;;  %v645_v27 = vstv %s1784_s6  ;;  %s1843_s6 = sld [smem:[#allocation9 + $0x100]] }
  0x71   : > { %v626_v25 = vrot.slane %v622_v18, 5  ;;  %v627_v26 = vrot.slane %v623_v19, 5  ;;  %v703_v28 = vstv %s1789_s7  ;;  %v638_v31 = vrot.slane %v634_v22, 6  ;;  %s1851_s7 = sld [smem:[#allocation9 + $0x101]] }
  0x72   : > { %v618_v29 = vadd.f32 %v614_v16, %v606_v20  ;;  %v619_v30 = vadd.f32 %v615_v17, %v607_v21  ;;  %v639_v33 = vrot.slane %v635_v23, 6  ;;  %v1821_v34 = vadd.f32 %v559_v53, %v551_v60 }
  0x73   : > { %v646_v35 = vmul.f32 %v645_v27, %v1632_v2  ;;  %v647_v36 = vmul.f32 %v645_v27, %v1634_v3  ;;  %v704_v37 = vmul.f32 %v703_v28, %v1696_v9  ;;  %v707_v40 = vstv %s1795_s8  ;;  %s1856_s8 = sld [smem:[#allocation9 + $0x102]] }
  0x74   : > { %v630_v38 = vadd.f32 %v626_v25, %v618_v29  ;;  %v631_v39 = vadd.f32 %v627_v26, %v619_v30  ;;  %v713_v41 = vstv %s1799_s11  ;;  %v705_v44 = vmul.f32 %v703_v28, %v1712_v24  ;;  %s1862_s11 = sld [smem:[#allocation9 + $0x103]] }
  0x75   : > { %v650_v42 = vrot.slane %v646_v35, 7  ;;  %v651_v43 = vrot.slane %v647_v36, 7  ;;  %v708_v2 = vmul.f32 %v707_v40, %v1748_v7  ;;  %v709_v46 = vmul.f32 %v707_v40, %v1766_v32 }
  0x76   : > { %v642_v3 = vadd.f32 %v638_v31, %v630_v38  ;;  %v643_v45 = vadd.f32 %v639_v33, %v631_v39  ;;  %v714_v47 = vmul.f32 %v713_v41, %v1793_v61  ;;  %v719_v49 = vstv %s1805_s29  ;;  %s1865_s29 = sld [smem:[#allocation9 + $0x300]] }
  0x77   : > { %v710_v48 = vadd.f32 %v708_v2, %v704_v37  ;;  %v664_v50 = vstv %s1807_s24  ;;  %v668_v51 = vstv %s1811_s10  ;;  %v674_v59 = vstv %s1817_s12  ;;  %s1869_s24 = sld [smem:[#allocation9 + $0x301]]  ;;  %s2131_s12 = smov 16  }
  0x78   : > { %v1845_v52 = vadd.f32 %v650_v42, %v642_v3  ;;  %v1847_v53 = vadd.f32 %v651_v43, %v643_v45  ;;  %v665_v54 = vmul.f32 %v664_v50, %v1696_v9  ;;  %v666_v55 = vmul.f32 %v664_v50, %v1712_v24  ;;  %s1874_s10 = sld [smem:[#allocation9 + $0x302]] }
  0x79   : > { %v716_v56 = vadd.f32 %v714_v47, %v710_v48  ;;  %v669_v57 = vmul.f32 %v668_v51, %v1748_v7  ;;  %v670_v58 = vmul.f32 %v668_v51, %v1766_v32  ;;  %v715_v60 = vmul.f32 %v713_v41, %v1821_v34 }
  0x7a   : > { %v720_v62 = vmul.f32 %v719_v49, %v1845_v52  ;;  %v675_v63 = vmul.f32 %v674_v59, %v1793_v61  ;;  %v676_v0 = vmul.f32 %v674_v59, %v1821_v34  ;;  %v680_v4 = vstv %s1819_s13  ;;  %s1879_s13 = sld [smem:[#allocation9 + $0x303]] }
  0x7b   : > { %v671_v1 = vadd.f32 %v669_v57, %v665_v54  ;;  %v711_v5 = vadd.f32 %v709_v46, %v705_v44  ;;  %v672_v6 = vadd.f32 %v670_v58, %v666_v55  ;;  %v681_v10 = vmul.f32 %v680_v4, %v1845_v52 }
  0x7c   : > { %v722_v8 = vadd.f32 %v720_v62, %v716_v56  ;;  %v776_v11 = vstv %s1826_s14  ;;  %v721_v12 = vmul.f32 %v719_v49, %v1847_v53  ;;  %v682_v14 = vmul.f32 %v680_v4, %v1847_v53  ;;  %s1883_s14 = sld [smem:[#allocation9 + $0x280]] }
  0x7d   : > { %v677_v13 = vadd.f32 %v675_v63, %v671_v1  ;;  %v778_v15 = vmul.f32 %v776_v11, %v1712_v24  ;;  %v717_v16 = vadd.f32 %v715_v60, %v711_v5  ;;  %v678_v17 = vadd.f32 %v676_v0, %v672_v6 }
  0x7e   : > { %724 = vrot.lane.b32.xlu1 %v722_v8, %s2131_s12  ;;  %v780_v18 = vstv %s1830_s17  ;;  %v786_v19 = vstv %s1834_s23  ;;  %v777_v22 = vmul.f32 %v776_v11, %v1696_v9  ;;  %s1474_s12 = smov 17   ;;  %v792_v27 = vstv %s1838_s30  ;;  %s1893_s17 = sld [smem:[#allocation9 + $0x282]] }
  0x7f   : > { %v683_v20 = vadd.f32 %v681_v10, %v677_v13  ;;  %v782_v21 = vmul.f32 %v780_v18, %v1766_v32  ;;  %v788_v23 = vmul.f32 %v786_v19, %v1821_v34  ;;  %v781_v25 = vmul.f32 %v780_v18, %v1748_v7  ;;  %s1897_s23 = sld [smem:[#allocation9 + $0x380]] }
  0x80   : > { %v739_v28 = vstv %s1843_s6  ;;  %v743_v29 = vstv %s1851_s7  ;;  %v723_v30 = vadd.f32 %v721_v12, %v717_v16  ;;  %v684_v31 = vadd.f32 %v682_v14, %v678_v17  ;;  %s1902_s30 = sld [smem:[#allocation9 + $0x381]]  ;;  %s2137_s7 = smov 16  }
  0x81   : > { %685 = vrot.lane.b32.xlu0 %v683_v20, %s1474_s12  ;;  %v784_v26 = vadd.f32 %v782_v21, %v778_v15  ;;  %v740_v33 = vmul.f32 %v739_v28, %v1696_v9  ;;  %v744_v35 = vmul.f32 %v743_v29, %v1748_v7  ;;  %v783_v36 = vadd.f32 %v781_v25, %v777_v22  ;;  %s1910_s6 = sld [smem:[#allocation9 + $0x283]] }
  0x82   : > { %v787_v37 = vmul.f32 %v786_v19, %v1793_v61  ;;  %v749_v38 = vstv %s1856_s8  ;;  %v755_v39 = vstv %s1862_s11  ;;  %v794_v41 = vmul.f32 %v792_v27, %v1847_v53  ;;  %s1919_s8 = sld [smem:[#allocation9 + $0x382]]  ;;  %s1475_s11 = smov 15  }
  0x83   : > { %v790_v40 = vadd.f32 %v788_v23, %v784_v26  ;;  %v746_v42 = vadd.f32 %v744_v35, %v740_v33  ;;  %v750_v43 = vmul.f32 %v749_v38, %v1793_v61  ;;  %v793_v44 = vmul.f32 %v792_v27, %v1845_v52 }
  0x84   : > { %v741_v2 = vmul.f32 %v739_v28, %v1712_v24  ;;  %v756_v3 = vmul.f32 %v755_v39, %v1845_v52  ;;  %v876_v45 = vstv %s1865_s29  ;;  %v745_v46 = vmul.f32 %v743_v29, %v1766_v32  ;;  %s1934_s29 = sld [smem:[#allocation9 + $0x383]] }
  0x85   : > { %v752_v47 = vadd.f32 %v750_v43, %v746_v42  ;;  %v877_v48 = vmul.f32 %v876_v45, %v1696_v9  ;;  %v880_v49 = vstv %s1869_s24  ;;  %v789_v50 = vadd.f32 %v787_v37, %v783_v36  ;;  %s1476_s24 = smov 1  }
  0x86   : > { %726 = vrot.lane.b32.xlu1 %v723_v30, %s2137_s7  ;;  %v881_v51 = vmul.f32 %v880_v49, %v1748_v7  ;;  %v886_v54 = vstv %s1874_s10  ;;  %v840_v55 = vstv %s1883_s14  ;;  %v796_v56 = vadd.f32 %v794_v41, %v790_v40  ;;  %s1952_s14 = sld [smem:[#allocation9 + $0x402]]  ;;  %s1479_s10 = smov 112  }
  0x87   : > { %v751_v57 = vmul.f32 %v749_v38, %v1821_v34  ;;  %v757_v58 = vmul.f32 %v755_v39, %v1847_v53  ;;  %v758_v59 = vadd.f32 %v756_v3, %v752_v47  ;;  %v887_v60 = vmul.f32 %v886_v54, %v1793_v61  ;;  %s1197_s7 = sld [smem:[#allocation9 + $0x201]] }
  0x88   : > { %v892_v62 = vstv %s1879_s13  ;;  %v842_v63 = vmul.f32 %v840_v55, %v1712_v24  ;;  %v844_v0 = vstv %s1887_s9  ;;  %v883_v1 = vadd.f32 %v881_v51, %v877_v48  ;;  %s1941_s9 = sld [smem:[#allocation9 + $0x400]]  ;;  %s1480_s13 = smov 111  }
  0x89   : > { %687 = vrot.lane.b32.xlu0 %v684_v31, %s1474_s12  ;;  %760 = vrot.lane.b32.xlu2 %v758_v59, %s1475_s11  ;;  %v846_v4 = vmul.f32 %v844_v0, %v1766_v32  ;;  %v850_v5 = vstv %s1893_s17  ;;  %v747_v6 = vadd.f32 %v745_v46, %v741_v2  ;;  %v913_v8 = vstv %s1897_s23  ;;  %s1945_s12 = sld [smem:[#allocation9 + $0x401]]  ;;  %s1477_s17 = smov 113  }
  0x8a   : > { %v917_v10 = vstv %s1902_s30  ;;  %v795_v11 = vadd.f32 %v793_v44, %v789_v50  ;;  %v893_v13 = vmul.f32 %v892_v62, %v1845_v52  ;;  %v852_v15 = vmul.f32 %v850_v5, %v1821_v34  ;;  %s1966_s23 = sld [smem:[#allocation9 + $0x403]]  ;;  %s1478_s30 = smov 127  }
  0x8b   : > { %v753_v12 = vadd.f32 %v751_v57, %v747_v6  ;;  %v848_v14 = vadd.f32 %v846_v4, %v842_v63  ;;  %v856_v16 = vstv %s1910_s6  ;;  %v889_v17 = vadd.f32 %v887_v60, %v883_v1  ;;  %s1196_s6 = sld [smem:[#allocation9 + $0x200]] }
  0x8c   : > { %v915_v19 = vmul.f32 %v913_v8, %v1712_v24  ;;  %v919_v20 = vmul.f32 %v917_v10, %v1766_v32  ;;  %v923_v21 = vstv %s1919_s8  ;;  %v858_v23 = vmul.f32 %v856_v16, %v1847_v53  ;;  %s1986_s8 = sld [smem:[#allocation9 + $0x202]] }
  0x8d   : > { %v759_v18 = vadd.f32 %v757_v58, %v753_v12  ;;  %v854_v22 = vadd.f32 %v852_v15, %v848_v14  ;;  %v914_v25 = vmul.f32 %v913_v8, %v1696_v9  ;;  %v918_v26 = vmul.f32 %v917_v10, %v1748_v7 }
  0x8e   : > { %799 = vrot.lane.b32.xlu1 %v796_v56, %s1476_s24  ;;  %v895_v27 = vadd.f32 %v893_v13, %v889_v17  ;;  %v921_v28 = vadd.f32 %v919_v20, %v915_v19  ;;  %v925_v29 = vmul.f32 %v923_v21, %v1821_v34  ;;  %v841_v30 = vmul.f32 %v840_v55, %v1696_v9 }
  0x8f   : > { %v929_v31 = vstv %s1934_s29  ;;  %v845_v33 = vmul.f32 %v844_v0, %v1748_v7  ;;  %v851_v35 = vmul.f32 %v850_v5, %v1793_v61  ;;  %v924_v36 = vmul.f32 %v923_v21, %v1793_v61 }
  0x90   : > { %v878_v37 = vmul.f32 %v876_v45, %v1712_v24  ;;  %v882_v38 = vmul.f32 %v880_v49, %v1766_v32  ;;  %v860_v39 = vadd.f32 %v858_v23, %v854_v22  ;;  %v920_v40 = vadd.f32 %v918_v26, %v914_v25 }
  0x91   : > { %797 = vrot.lane.b32.xlu0 %v795_v11, %s1476_s24  ;;  %762 = vrot.lane.b32.xlu2 %v759_v18, %s1475_s11  ;;  %v847_v41 = vadd.f32 %v845_v33, %v841_v30  ;;  %v857_v42 = vmul.f32 %v856_v16, %v1845_v52  ;;  %v927_v43 = vadd.f32 %v925_v29, %v921_v28  ;;  %v949_v2 = vstv %s1941_s9  ;;  %s1992_s11 = sld [smem:[#allocation9 + $0x203]]  ;;  %v2004_v33 = vld [vmem:[%s2125_s1] ss:$2 sm:$0x3]  ;;  %s1412_s24 = scalar_lea.hbm %s2129_s5, 32 }
  0x92   : > { %v931_v44 = vmul.f32 %v929_v31, %v1847_v53  ;;  %v953_v3 = vstv %s1945_s12  ;;  %v884_v46 = vadd.f32 %v882_v38, %v878_v37  ;;  %v888_v47 = vmul.f32 %v886_v54, %v1821_v34 }
  0x93   : > { %v853_v45 = vadd.f32 %v851_v35, %v847_v41  ;;  %v930_v48 = vmul.f32 %v929_v31, %v1845_v52  ;;  %v926_v49 = vadd.f32 %v924_v36, %v920_v40  ;;  %v951_v50 = vmul.f32 %v949_v2, %v1712_v24  ;;  %v2011_v36 = vld [vmem:[%s2125_s1 + $0x1] ss:$2 sm:$0x3] }
  0x94   : > { %v955_v51 = vmul.f32 %v953_v3, %v1766_v32  ;;  %v933_v56 = vadd.f32 %v931_v44, %v927_v43  ;;  %v959_v57 = vstv %s1952_s14  ;;  %v890_v58 = vadd.f32 %v888_v47, %v884_v46  ;;  %s1223_s14 = sshll.u32 %s1532_s22, 4 }
  0x95   : > { %v859_v55 = vadd.f32 %v857_v42, %v853_v45  ;;  %v894_v59 = vmul.f32 %v892_v62, %v1847_v53  ;;  %v950_v54 = vmul.f32 %v949_v2, %v1696_v9  ;;  %v954_v60 = vmul.f32 %v953_v3, %v1748_v7 }
  0x96   : > { %897 = vrot.lane.b32.xlu1 %v895_v27, %s1477_s17  ;;  %v932_v63 = vadd.f32 %v930_v48, %v926_v49  ;;  %v957_v0 = vadd.f32 %v955_v51, %v951_v50  ;;  %v961_v1 = vmul.f32 %v959_v57, %v1821_v34  ;;  %v965_v4 = vstv %s1966_s23 }
  0x97   : > { %v896_v5 = vadd.f32 %v894_v59, %v890_v58  ;;  %v956_v6 = vadd.f32 %v954_v60, %v950_v54  ;;  %v960_v8 = vmul.f32 %v959_v57, %v1793_v61  ;;  %v967_v11 = vmul.f32 %v965_v4, %v1847_v53 }
  0x98   : > { %v963_v10 = vadd.f32 %v961_v1, %v957_v0  ;;  %v966_v12 = vmul.f32 %v965_v4, %v1845_v52  ;;  %v689_v18 = vlaneseq  ;;  %v812_v23 = vstv %s1196_s6 }
  0x99   : > { %863 = vrot.lane.b32.xlu0 %v860_v39, %s1478_s30  ;;  %861 = vrot.lane.b32.xlu2 %v859_v55, %s1478_s30  ;;  %v962_v62 = vadd.f32 %v960_v8, %v956_v6  ;;  %v816_v25 = vstv %s1197_s7  ;;  %v814_v29 = vmul.f32 %v812_v23, %v1712_v24  ;;  %v822_v31 = vstv %s1986_s8  ;;  %s1025_s30 = scalar_lea.hbm %s2129_s5, %s1223_s14  ;;  %s1014_s7 = scalar_lea.sflag [#allocation4], %s1610_s28 }
  0x9a   : > { %v969_v13 = vadd.f32 %v967_v11, %v963_v10  ;;  %v1988_v20 = vand.u32 127, %v689_v18  ;;  %v818_v30 = vmul.f32 %v816_v25, %v1766_v32  ;;  %v813_v35 = vmul.f32 %v812_v23, %v1696_v9  ;;  %s1029_s22 = sshll.u32 %s1025_s30, 4  ;;  %s1030_s22 = int_to_ptr.hbm [resolvable:$true] %s1029_s22 }
  0x9b   : > { %v968_v14 = vadd.f32 %v966_v12, %v962_v62  ;;  %v817_v39 = vmul.f32 %v816_v25, %v1748_v7  ;;  %vm661_vm4 = vcmp.ge.s32.totalorder %v2011_v36, 1  ;;  %v824_v41 = vmul.f32 %v822_v31, %v1821_v34  ;;  %s1406_s8 = sshra.s32 %s1030_s22, 4  ;;  %s1407_s8 = int_to_ptr.hbm [resolvable:$true] %s1406_s8 }
  0x9c   : > { %vm728_vm0 = vcmp.lt.s32.totalorder %v1988_v20, 16  ;;  %vm691_vm1 = vcmp.lt.s32.totalorder %v1988_v20, 17  ;;  %vm764_vm2 = vcmp.lt.s32.totalorder %v1988_v20, 15  ;;  %vm801_vm3 = vcmp.lt.s32.totalorder %v1988_v20, 1  ;;  %p1413_p9 = scmp.lt.s32.totalorder %s1407_s8, %s2129_s5 }
  0x9d   : > { %v820_v40 = vadd.f32 %v818_v30, %v814_v29  ;;  %vm659_vm5 = vcmp.ge.s32.totalorder %v2004_v33, 1  ;;  %v828_v9 = vstv %s1992_s11  ;;  %v819_v45 = vadd.f32 %v817_v39, %v813_v35  ;;  %s1408_s11 = scalar_lea.hbm %s1407_s8, 16 }
  0x9e   : > { %936 = vrot.lane.b32.xlu1 %v933_v56, %s1479_s10  ;;  %vm2032_vm7 = vmand %vm659_vm5, %vm661_vm4  ;;  %v823_v46 = vmul.f32 %v822_v31, %v1793_v61  ;;  %v830_v49 = vmul.f32 %v828_v9, %v1847_v53  ;;  %vm865_vm8 = vcmp.lt.s32.totalorder %v1988_v20, 127  ;;  %vm662_vm9 = vcmp.lt.s32.totalorder %v2011_v36, 15  ;;  %p1409_p1 = scmp.ne.s32.totalorder %s1407_s8, %s1408_s11  ;;  %p1414_p10 = scmp.lt.s32.totalorder %s1412_s24, %s1408_s11 }
  0x9f   : > { %v826_v48 = vadd.f32 %v824_v41, %v820_v40  ;;  %v829_v58 = vmul.f32 %v828_v9, %v1845_v52  ;;  %vm767_vm10 = vmand %vm659_vm5, %vm662_vm9  ;;  %vm901_vm11 = vcmp.lt.s32.totalorder %v1988_v20, 113  ;;  %vm938_vm12 = vcmp.lt.s32.totalorder %v1988_v20, 112 }
  0xa0   : > { %v825_v61 = vadd.f32 %v823_v46, %v819_v45  ;;  %vm660_vm13 = vcmp.lt.s32.totalorder %v2004_v33, 15  ;;  %vm974_vm15 = vcmp.lt.s32.totalorder %v1988_v20, 111  ;;  %p1410_p4 = pnand %p1409_p1, %p1583_p3  ;;  %p1415_p2 = por %p1414_p10, %p1413_p9 }
  0xa1   : > { %934 = vrot.lane.b32.xlu0 %v932_v63, %s1479_s10  ;;  %899 = vrot.lane.b32.xlu2 %v896_v5, %s1477_s17  ;;  %v832_v54 = vadd.f32 %v830_v49, %v826_v48  ;;  %vm904_vm14 = vmand %vm660_vm13, %vm661_vm4  ;;  %s2140_s10 = sshll.u32 %s1610_s28, 4 }
  0xa2   : > { %v831_v4 = vadd.f32 %v829_v58, %v825_v61  ;;  %p1411_p8 = pneg %p1410_p4 }
  0xa3   : > { %v835_v10 = vrot.slane %v832_v54, 7 }
  0xa4   : > { %p1416_p11 = pnand %p1415_p2, %p1411_p8 }
  0xa5   : > { %v836_v18 = vsel %vm698_vm6, %v831_v4, %v835_v10 }
  0xa9   : > { %972 = vrot.lane.b32.xlu0 %v969_v13, %s1480_s13  ;;  %970 = vrot.lane.b32.xlu2 %v968_v14, %s1480_s13  ;;  %s283_s13 = scalar_lea.vmem [#allocation10], %s2140_s10 }
  0xaa   : > { %s1027_s6 = sshll.u32 %s283_s13, 4  ;;  %s1028_s6 = int_to_ptr.vmem [resolvable:$true] %s1027_s6 }
  0xe3   : > { %v761_v16 = vpop.permute.xlu2 %760 }
  0xeb   : > { %v763_v21 = vpop.permute.xlu2 %762 }
  0xec   : > { %v765_v42 = vsel %vm764_vm2, %v761_v16, %v763_v21  ;;  %v766_v55 = vsel %vm764_vm2, %v763_v21, %v761_v16 }
  0xed   : > { %v770_v50 = vrot.slane %v765_v42, 7 }
  0xef   : > { %v771_v63 = vsel %vm698_vm6, %v766_v55, %v770_v50 }
  0xf0   : > { %v725_v15 = vpop.permute.xlu1 %724  ;;  %v773_v6 = vsel %vm767_vm10, %v771_v63, 0.0 }
  0xf3   : > { %v686_v17 = vpop.permute.xlu0 %685  ;;  %v862_v38 = vpop.permute.xlu2 %861 }
  0xf8   : > { %v727_v19 = vpop.permute.xlu1 %726 }
  0xf9   : > { %v729_v26 = vsel %vm728_vm0, %v725_v15, %v727_v19  ;;  %v730_v43 = vsel %vm728_vm0, %v727_v19, %v725_v15  ;;  %vm977_vm0 = vmand %vm660_vm13, %vm662_vm9 }
  0xfa   : > { %v733_v37 = vrot.slane %v729_v26, 7 }
  0xfb   : > { %v688_v22 = vpop.permute.xlu0 %687  ;;  %v900_v52 = vpop.permute.xlu2 %899 }
  0xfc   : > { %v692_v27 = vsel %vm691_vm1, %v686_v17, %v688_v22  ;;  %v693_v44 = vsel %vm691_vm1, %v688_v22, %v686_v17  ;;  %v734_v2 = vsel %vm698_vm6, %v730_v43, %v733_v37 }
  0xfd   : > { %v697_v24 = vrot.slane %v692_v27, 7  ;;  %v736_v56 = vsel %vm659_vm5, %v734_v2, 0.0 }
  0xff   : > { %v699_v3 = vsel %vm698_vm6, %v693_v44, %v697_v24 }
 0x100   : > { %v800_v28 = vpop.permute.xlu1 %799  ;;  %v701_v57 = vsel %vm2032_vm7, %v699_v3, 0.0 }
 0x101   : > { %v737_v0 = vadd.f32 %v736_v56, %v701_v57  ;;  %v1316_v56 = vld [vmem:[%s1616_s15 + $0x8] sm:$0xff] }
 0x103   : > { %v798_v32 = vpop.permute.xlu0 %797  ;;  %v774_v62 = vadd.f32 %v773_v6, %v737_v0  ;;  %v971_v30 = vpop.permute.xlu2 %970 }
 0x104   : > { %v802_v7 = vsel %vm801_vm3, %v798_v32, %v800_v28  ;;  %v803_v53 = vsel %vm801_vm3, %v800_v28, %v798_v32 }
 0x105   : > { %v806_v51 = vrot.slane %v802_v7, 7 }
 0x107   : > { %v807_v1 = vsel %vm698_vm6, %v803_v53, %v806_v51  ;;  %v1315_v51 = vld [vmem:[%s1616_s15] sm:$0xff] }
 0x108   : > { %v898_v47 = vpop.permute.xlu1 %897  ;;  %v809_v8 = vsel %vm661_vm4, %v807_v1, 0.0 }
 0x109   : > { %v903_v11 = vsel %vm901_vm11, %v900_v52, %v898_v47  ;;  %v810_v14 = vadd.f32 %v809_v8, %v774_v62  ;;  %v902_v19 = vsel %vm901_vm11, %v898_v47, %v900_v52 }
 0x10a   : > { %v907_v16 = vrot.slane %v903_v11, 7 }
 0x10b   : > { %v864_v59 = vpop.permute.xlu0 %863  ;;  %v838_v25 = vadd.f32 %v836_v18, %v810_v14 }
 0x10c   : > { %v867_v60 = vsel %vm865_vm8, %v864_v59, %v862_v38  ;;  %v866_v13 = vsel %vm865_vm8, %v862_v38, %v864_v59  ;;  %v908_v26 = vsel %vm698_vm6, %v902_v19, %v907_v16 }
 0x10d   : > { %v870_v5 = vrot.slane %v867_v60, 7  ;;  %v910_v31 = vsel %vm904_vm14, %v908_v26, 0.0 }
 0x10f   : > { %v871_v15 = vsel %vm698_vm6, %v866_v13, %v870_v5 }
 0x110   : > { %v937_v12 = vpop.permute.xlu1 %936  ;;  %v873_v23 = vsel %vm662_vm9, %v871_v15, 0.0 }
 0x111   : > { %v874_v28 = vadd.f32 %v873_v23, %v838_v25 }
 0x113   : > { %v935_v17 = vpop.permute.xlu0 %934  ;;  %v911_v32 = vadd.f32 %v910_v31, %v874_v28 }
 0x114   : > { %v940_v21 = vsel %vm938_vm12, %v937_v12, %v935_v17  ;;  %v939_v27 = vsel %vm938_vm12, %v935_v17, %v937_v12 }
 0x115   : > { %v943_v22 = vrot.slane %v940_v21, 7 }
 0x117   : > { %v944_v29 = vsel %vm698_vm6, %v939_v27, %v943_v22 }
 0x118   : > { %v946_v37 = vsel %vm660_vm13, %v944_v29, 0.0 }
 0x119   : > { %v947_v40 = vadd.f32 %v946_v37, %v911_v32 }
 0x11b   : > { %v973_v35 = vpop.permute.xlu0 %972 }
 0x11c   : > { %v976_v24 = vsel %vm974_vm15, %v973_v35, %v971_v30  ;;  %v975_v39 = vsel %vm974_vm15, %v971_v30, %v973_v35 }
 0x11d   : > { %v980_v38 = vrot.slane %v976_v24, 7 }
 0x11f   : > { %v981_v41 = vsel %vm698_vm6, %v975_v39, %v980_v38 }
 0x120   : > { %v983_v9 = vsel %vm977_vm0, %v981_v41, 0.0 }
 0x121   : > { %v984_v20 = vadd.f32 %v983_v9, %v947_v40 }
 0x123   : > { %v1216_v42 = vmul.f32 -1.442695, %v984_v20 }
 0x125   : > { %1311 = vpow2.f32 %v1216_v42 }
 0x12b   : > { %v1312_v43 = vpop.eup %1311 }
 0x12c   : > { %v988_v44 = vadd.f32 1.0, %v1312_v43 }
 0x12e   : > { %1313 = vrcp.f32 %v988_v44  ;;  %v1000_v36 = vand.u32 2147483648, %v988_v44  ;;  %v998_v3 = vand.u32 2147483647, %v988_v44  ;;  %vm994_vm2 = vweird.f32 %v988_v44 }
 0x130   : > { %v1001_v46 = vor.u32 1.1754944e-38, %v1000_v36  ;;  %vm999_vm4 = vcmp.eq.f32.partialorder %v998_v3, 8.507059e+37 }
 0x134   : > { %v1314_v7 = vpop.eup %1313 }
 0x135   : > { %v990_v2 = vmul.f32 %v1314_v7, %v988_v44  ;;  %vm995_vm1 = vweird.f32 %v1314_v7 }
 0x136   : > { %vm996_vm3 = vmor %vm994_vm2, %vm995_vm1 }
 0x137   : > { %v991_v34 = vsub.f32 1.0, %v990_v2 }
 0x139   : > { %v992_v33 = vmul.f32 %v1314_v7, %v991_v34 }
 0x13b   : > { %v993_v45 = vadd.f32 %v1314_v7, %v992_v33 }
 0x13d   : > { %v997_v47 = vsel %vm996_vm3, %v1314_v7, %v993_v45 }
 0x13e   : > { %v1002_v48 = vsel %vm999_vm4, %v1001_v46, %v997_v47 }
 0x13f   : > { %v1005_v49 = vperm.slane %v1002_v48, 0  ;;  %v1006_v50 = vperm.slane %v1002_v48, 1 }
 0x141   : > { %v1009_v55 = vmul.f32 %v1315_v51, %v1005_v49  ;;  %v1010_v57 = vmul.f32 %v1316_v56, %v1006_v50 }
 0x143   : > { %1011 = vst [vmem:[%s283_s13] sm:$0xff] %v1009_v55 }
 0x144   : > { %1012 = vst [vmem:[%s283_s13 + $0x8] sm:$0xff] %v1010_v57 }
 0x145   : > { %1419 = shalt.err (!%p1416_p11)
}
 0x146   : > { %1238 = dma.vmem_to_hbm [thread:$0]  (%p1583_p3), %s1028_s6, 256, %s1030_s22, %s1014_s7  }
 0x147 PF: > { %s1041_s28 = sand.u32 1, %s1454_s18   ;;  %p2141_p12 = scmp.ge.s32.totalorder %s1466_s21, 2 }
 0x148   : > { %s1042_s15 = scalar_lea.sflag [#allocation4], %s1041_s28 }
 0x149   : > { %p1255_p13 = pnand %p2141_p12, %p1546_p6 }
 0x14b   : > { %p1256_p0 = pneg %p1255_p13 }
 0x14d   : > { %1449 = dma.done.wait (%p1256_p0), %s1042_s15, 256  }
 0x14e   : > { %1451 = vsyncadd (%p1256_p0), %s1042_s15, 4294967040  ;;  %p20_p5 = scmp.ge.s32.totalorder %s1570_s16, 4   ;;  %s2142_s18 = smov %s1458_s19 }
 0x14f   : > { %s2143_s19 = smov %s1462_s20  ;;  %s2144_s20 = smov %s1579_s26 }
 0x150   : > { %s2145_s21 = smov %s1570_s16  ;;  %22 = sbr.rel (!%p20_p5) target bundleno = 7 (0x7), region = 99 }
 0x155   :  { %1048 = vsyncpa [#allocation3], 1 }
 0x156   :  { %1050 = vsyncpa [#allocation3 + $0x1], 1 }
 0x157   :  { %1051 = vsyncpa [#allocation4], 1 }
 0x158   :  { %1053 = vsyncpa [#allocation4 + $0x1], 1 }
 0x159   :  { %1054 = vsyncpa [#allocation5], 1 }
 0x15a   :  { %1056 = vsyncpa [#allocation5 + $0x1], 1 }
 0x15b   :  { %1057 = vsyncpa [#allocation8], 1 }

</bundles_post_ra>
